<compile_context>
chip_gen: v6e
topology: v6e:2x2x1
jax: 0.10.0
libtpu: 0.0.40
codegen_flags: <defaults>
</compile_context>

<pallas_src>
import functools
import math

import jax
import jax.numpy as jnp
import numpy as np
from jax import lax
from jax.experimental import pallas as pl
from jax.experimental.pallas import tpu as pltpu


def _dot(a, b):
    return jnp.dot(a, b, preferred_element_type=jnp.float32)


def _dot_t(a, b):
    # a^T @ b without materializing a transpose: contract axis 0 of both.
    return lax.dot_general(a, b, dimension_numbers=(((0,), (0,)), ((), ())),
                           preferred_element_type=jnp.float32)


# ----------------------------------------------------------------------------
# Fused Pallas kernel: n_layers x (fc + attention + edge softmax + message
# aggregation + self loop + relu) followed by weighted-sum readout.
# ----------------------------------------------------------------------------
def make_fused_kernel(n_layers: int, N: int, E: int, H: int, D: int,
                      negative_slope: float = 0.2):
    HD = H * D

    def kernel(h0_ref, state_ref, sd_ref, rel_ref, mask_ref, w_ref,
               wbig_ref, attn3_ref, wn_ref, b_ref, ist_ref, out_ref):
        SD = sd_ref[...]          # (E, 2N) f32, [S | Dm] stacked incidence
        S = SD[:, :N]             # (E, N)  one-hot src
        Dm = SD[:, N:]            # (E, N)  one-hot dst
        Bm = b_ref[...]           # (H, HD) head -> per-dim block broadcast
        Ist = ist_ref[...]        # (HD, D) stacked identities (head-sum)
        mask = mask_ref[...]      # (N, 1)  1.0 where in-degree > 0
        state_v = state_ref[...]  # (N, D)

        # Hoisted out of the layer loop: per-layer relation contribution,
        # already aggregated onto destination nodes.
        rel_proj = _dot(rel_ref[...], wn_ref[...])      # (E, L*D)  rel @ [wn_0|...]
        rel_agg = _dot_t(Dm, rel_proj)                  # (N, L*D)  Dm^T @ rel_proj

        h = h0_ref[...]                                 # (N, D)
        for l in range(n_layers):                       # static unroll
            hs = jnp.concatenate([h, state_v], axis=0)  # (2N, D)
            # one matmul -> fc(h) | h@loop_w | h@evolve_loop_w | fc(state) | ...
            proj = _dot(hs, wbig_ref[l])                # (2N, HD + 2D)
            feat = proj[:N, :HD]                        # (N, HD)  fc(h)
            loop_l = proj[:N, HD:HD + D]                # (N, D)   h @ loop_weight
            loop_e = proj[:N, HD + D:HD + 2 * D]        # (N, D)   h @ evolve_loop_weight

            # ONE logit dot: [el | er | *] from feat rows, [* | * | es] from state rows
            logits = _dot(proj[:, :HD], attn3_ref[l])   # (2N, 3H)
            el = logits[:N, 0:H]
            er = logits[:N, H:2 * H]
            es = logits[N:, 2 * H:3 * H]

            # e[edge] = el[src] + es[src] + er[dst], in ONE gather matmul
            gath = jnp.concatenate([el + es, er], axis=0)          # (2N, H)
            e_edge = _dot(SD, gath)                                # (E, H)
            e_edge = jnp.where(e_edge > 0, e_edge,
                               negative_slope * e_edge)            # leaky_relu

            # edge softmax per destination node per head.  A global max shift
            # is group-uniform so the per-group softmax is unchanged.
            p = jnp.exp(e_edge - jnp.max(e_edge))                  # (E, H)
            denom = _dot_t(Dm, p)                                  # (N, H)
            denom_e = _dot(Dm, denom)                              # (E, H)
            a = p / denom_e                                        # exact division

            # messages: sum_h a[:,h] * feat[src][:, h*D:(h+1)*D]
            ft_src = _dot(S, feat)                                 # (E, HD)
            a_full = _dot(a, Bm)                                   # (E, HD)
            node = _dot(a_full * ft_src, Ist)                      # (E, D)

            # aggregate onto destinations + hoisted relation term
            h_agg = _dot_t(Dm, node) + rel_agg[:, l * D:(l + 1) * D]   # (N, D)

            # self loop: loop_weight where in-degree > 0, evolve_loop otherwise
            loop_msg = jnp.where(mask > 0, loop_l, loop_e)         # (N, D)
            h = jnp.maximum(h_agg + loop_msg, 0.0)                 # relu

        # merged output: rows [0:N] = emb, row N = weighted-sum readout
        out_ref[pl.ds(0, N), :] = h
        out_ref[pl.ds(N, 1), :] = _dot(w_ref[...], h)

    return kernel


# ----------------------------------------------------------------------------
# Wrapper: jitted glue (embedding lookups, one-hot incidence, stacking) + one
# pallas_call for the whole forward pass.
# ----------------------------------------------------------------------------
@functools.partial(jax.jit, static_argnames=("num_heads", "out_feat", "n_layers"))
def aurgcn_forward(node_ids, src, dst, rel_type, readout_weight, state,
                   code_emb, rel_emb, stacked_params, *, num_heads, out_feat,
                   n_layers):
    N = node_ids.shape[0]
    E = src.shape[0]
    H, D = num_heads, out_feat

    h0 = code_emb[node_ids].astype(jnp.float32)                 # (N, D)
    S = jax.nn.one_hot(src, N, dtype=jnp.float32)               # (E, N)
    Dm = jax.nn.one_hot(dst, N, dtype=jnp.float32)              # (E, N)
    SD = jnp.concatenate([S, Dm], axis=1)                       # (E, 2N)
    rel_e = rel_emb[rel_type].astype(jnp.float32)               # (E, D)
    mask = (jnp.sum(Dm, axis=0) > 0).astype(jnp.float32)[:, None]   # (N, 1)
    w_row = readout_weight.reshape(1, N).astype(jnp.float32)    # (1, N)

    # trace-time numpy constants for the matmul-based per-head broadcast / sum
    B = np.kron(np.eye(H, dtype=np.float32),
                np.ones((1, D), np.float32))                    # (H, HD)
    Ist = np.tile(np.eye(D, dtype=np.float32), (H, 1))          # (HD, D)

    kernel = make_fused_kernel(n_layers, N, E, H, D)
    vmem = pl.BlockSpec(memory_space=pltpu.MemorySpace.VMEM)
    out = pl.pallas_call(
        kernel,
        out_shape=jax.ShapeDtypeStruct((N + 1, D), jnp.float32),
        in_specs=[vmem] * 11,
        out_specs=vmem,
    )(h0, state.astype(jnp.float32), SD, rel_e, mask, w_row,
      stacked_params["wbig"], stacked_params["attn3"], stacked_params["wn_all"],
      jnp.asarray(B), jnp.asarray(Ist))

    emb = out[:N]           # (N, D)
    x = out[N:N + 1]        # (1, D) weighted-sum readout
    return x, emb


# ----------------------------------------------------------------------------
# Parameter init (deterministic, synthetic) + host-side weight stacking
# ----------------------------------------------------------------------------
def xavier_normal(key, shape, gain):
    fan_in, fan_out = shape[0], shape[-1]
    std = gain * math.sqrt(2.0 / (fan_in + fan_out))
    return std * jax.random.normal(key, shape, jnp.float32)


def expand_attn(attn, H, D):
    # attn: (H, D) -> (H*D, H) block-diag columns so that
    # feat_flat @ A == (feat3 * attn).sum(-1)
    return (jnp.eye(H, dtype=jnp.float32)[:, None, :] * attn[:, :, None]
            ).reshape(H * D, H)


def make_layer_params(key, D, H, gain):
    ks = jax.random.split(key, 7)
    attn_l = xavier_normal(ks[0], (H, D), gain)
    attn_r = xavier_normal(ks[1], (H, D), gain)
    attn_s = xavier_normal(ks[2], (H, D), gain)
    return dict(
        wfc=xavier_normal(ks[3], (D, H * D), gain),   # fc: h @ W -> (N, H*D)
        wn=xavier_normal(ks[4], (D, D), gain),        # weight_neighbor
        wl=xavier_normal(ks[5], (D, D), gain),        # loop_weight
        we=xavier_normal(ks[6], (D, D), gain),        # evolve_loop_weight
        attn_l=attn_l, attn_r=attn_r, attn_s=attn_s,
        Al=expand_attn(attn_l, H, D),
        Ar=expand_attn(attn_r, H, D),
        As=expand_attn(attn_s, H, D),
    )


def stack_layer_params(layer_params):
    wbig = jnp.stack([jnp.concatenate([p["wfc"], p["wl"], p["we"]], axis=1)
                      for p in layer_params])                       # (L, D, HD+2D)
    attn3 = jnp.stack([jnp.concatenate([p["Al"], p["Ar"], p["As"]], axis=1)
                       for p in layer_params])                      # (L, HD, 3H)
    wn_all = jnp.concatenate([p["wn"] for p in layer_params], axis=1)  # (D, L*D)
    return dict(wbig=wbig, attn3=attn3, wn_all=wn_all)


# ----------------------------------------------------------------------------
# Pure-JAX reference (mirrors torch/DGL semantics) for correctness check
# ----------------------------------------------------------------------------
def ref_layer(h, state, src, dst, rel_e, p, mask, N, H, D, neg=0.2):
    feat = (h @ p["wfc"]).reshape(N, H, D)
    sfeat = (state @ p["wfc"]).reshape(N, H, D)
    el = (feat * p["attn_l"]).sum(-1)
    er = (feat * p["attn_r"]).sum(-1)
    es = (sfeat * p["attn_s"]).sum(-1)
    e = el[src] + er[dst] + es[src]
    e = jnp.where(e > 0, e, neg * e)
    m = jax.ops.segment_max(e, dst, num_segments=N)
    ee = jnp.exp(e - m[dst])
    den = jax.ops.segment_sum(ee, dst, num_segments=N)
    a = ee / den[dst]
    node = (a[..., None] * feat[src]).sum(1)
    msg = node + rel_e @ p["wn"]
    h_agg = jax.ops.segment_sum(msg, dst, num_segments=N)
    loop = jnp.where(mask > 0, h @ p["wl"], h @ p["we"])
    return jnp.maximum(h_agg + loop, 0.0)


# ----------------------------------------------------------------------------
if __name__ == "__main__":
    # args: n_codes=10, n_rels=5, emb_dim=32, n_layers=2, dropout=0.0, num_heads=4
    n_codes, n_rels, D, n_layers, H = 10, 5, 32, 2, 4
    N, E = 16, 24
    gain = math.sqrt(2.0)  # calculate_gain('relu')

    key = jax.random.PRNGKey(0)
    (k_emb, k_rel, k_id, k_src, k_dst, k_rt,
     k_w, k_state, k_l0, k_l1) = jax.random.split(key, 10)

    code_emb = jax.random.uniform(k_emb, (n_codes, D), jnp.float32, -1.0, 1.0)
    rel_emb = jax.random.uniform(k_rel, (n_rels, D), jnp.float32, -1.0, 1.0)

    node_ids = jax.random.randint(k_id, (N,), 0, n_codes)
    src = jax.random.randint(k_src, (E,), 0, N)
    dst = jax.random.randint(k_dst, (E,), 0, N)
    rel_type = jax.random.randint(k_rt, (E,), 0, n_rels)
    readout_weight = jax.random.uniform(k_w, (N,), jnp.float32)
    state = jax.random.normal(k_state, (N, D), jnp.float32)

    layer_params = [make_layer_params(k_l0, D, H, gain),
                    make_layer_params(k_l1, D, H, gain)]
    stacked = stack_layer_params(layer_params)

    x, emb = aurgcn_forward(node_ids, src, dst, rel_type, readout_weight, state,
                            code_emb, rel_emb, stacked,
                            num_heads=H, out_feat=D, n_layers=n_layers)
    x = jax.block_until_ready(x)

    # pure-JAX reference
    h_ref = code_emb[node_ids]
    rel_e = rel_emb[rel_type]
    mask = (jax.ops.segment_sum(jnp.ones((E,)), dst, num_segments=N) > 0
            ).astype(jnp.float32)[:, None]
    for p in layer_params:
        h_ref = ref_layer(h_ref, state, src, dst, rel_e, p, mask, N, H, D)
    x_ref = readout_weight.reshape(1, N) @ h_ref

    # Tolerance covers the known precision gap between XLA's default
    # bf16-input matmul path (used by the reference / interpret-mode dots) and
    # the kernel's full-precision f32 MXU passes, compounded over 2 layers.
    np.testing.assert_allclose(np.asarray(emb), np.asarray(h_ref),
                               rtol=2e-2, atol=2e-2)
    np.testing.assert_allclose(np.asarray(x), np.asarray(x_ref),
                               rtol=2e-2, atol=2e-2)

    print("KERNEL_OK")
</pallas_src>

<mosaic_0001>
module attributes {stable_mosaic.version = 11 : i64} {
  func.func @kernel(%arg0: memref<16x32xf32, #tpu.memory_space<vmem>>, %arg1: memref<16x32xf32, #tpu.memory_space<vmem>>, %arg2: memref<24x32xf32, #tpu.memory_space<vmem>>, %arg3: memref<24x32xf32, #tpu.memory_space<vmem>>, %arg4: memref<16x1xf32, #tpu.memory_space<vmem>>, %arg5: memref<1x16xf32, #tpu.memory_space<vmem>>, %arg6: memref<2x32x192xf32, #tpu.memory_space<vmem>>, %arg7: memref<2x128x12xf32, #tpu.memory_space<vmem>>, %arg8: memref<32x64xf32, #tpu.memory_space<vmem>>, %arg9: memref<4x128xf32, #tpu.memory_space<vmem>>, %arg10: memref<128x32xf32, #tpu.memory_space<vmem>>, %arg11: memref<17x32xf32, #tpu.memory_space<vmem>>) attributes {dimension_semantics = [], scalar_prefetch = 0 : i64, scratch_operands = 0 : i64, tpu.core_type = #tpu.core_type<tc>} {
    %c0 = arith.constant 0 : index
    %c0_0 = arith.constant 0 : index
    %0 = vector.load %arg2[%c0, %c0_0] : memref<24x32xf32, #tpu.memory_space<vmem>>, vector<24x32xf32>
    %1 = vector.extract_strided_slice %0 {offsets = [0, 0], sizes = [24, 16], strides = [1, 1]} : vector<24x32xf32> to vector<24x16xf32>
    %2 = vector.extract_strided_slice %0 {offsets = [0, 16], sizes = [24, 16], strides = [1, 1]} : vector<24x32xf32> to vector<24x16xf32>
    %c0_1 = arith.constant 0 : index
    %c0_2 = arith.constant 0 : index
    %3 = vector.load %arg9[%c0_1, %c0_2] : memref<4x128xf32, #tpu.memory_space<vmem>>, vector<4x128xf32>
    %c0_3 = arith.constant 0 : index
    %c0_4 = arith.constant 0 : index
    %4 = vector.load %arg10[%c0_3, %c0_4] : memref<128x32xf32, #tpu.memory_space<vmem>>, vector<128x32xf32>
    %c0_5 = arith.constant 0 : index
    %c0_6 = arith.constant 0 : index
    %5 = vector.load %arg4[%c0_5, %c0_6] : memref<16x1xf32, #tpu.memory_space<vmem>>, vector<16x1xf32>
    %c0_7 = arith.constant 0 : index
    %c0_8 = arith.constant 0 : index
    %6 = vector.load %arg1[%c0_7, %c0_8] : memref<16x32xf32, #tpu.memory_space<vmem>>, vector<16x32xf32>
    %c0_9 = arith.constant 0 : index
    %c0_10 = arith.constant 0 : index
    %7 = vector.load %arg3[%c0_9, %c0_10] : memref<24x32xf32, #tpu.memory_space<vmem>>, vector<24x32xf32>
    %c0_11 = arith.constant 0 : index
    %c0_12 = arith.constant 0 : index
    %8 = vector.load %arg8[%c0_11, %c0_12] : memref<32x64xf32, #tpu.memory_space<vmem>>, vector<32x64xf32>
    %cst = arith.constant dense<0.000000e+00> : vector<24x64xf32>
    %9 = tpu.matmul %7, %8, %cst {dimension_numbers = #tpu.dot_dimension_numbers<[1], [0], [0], [1], [0, 0, 1, 1], [], []>} : vector<24x32xf32>, vector<32x64xf32>, vector<24x64xf32> -> vector<24x64xf32>
    %cst_13 = arith.constant dense<0.000000e+00> : vector<16x64xf32>
    %10 = tpu.matmul %2, %9, %cst_13 {dimension_numbers = #tpu.dot_dimension_numbers<[0], [0], [1], [1], [0, 1, 1, 1], [], []>} : vector<24x16xf32>, vector<24x64xf32>, vector<16x64xf32> -> vector<16x64xf32>
    %c0_14 = arith.constant 0 : index
    %c0_15 = arith.constant 0 : index
    %11 = vector.load %arg0[%c0_14, %c0_15] : memref<16x32xf32, #tpu.memory_space<vmem>>, vector<16x32xf32>
    %12 = tpu.concatenate %11, %6 in 0 : vector<16x32xf32>, vector<16x32xf32> -> vector<32x32xf32>
    %c0_16 = arith.constant 0 : index
    %c0_17 = arith.constant 0 : index
    %c0_18 = arith.constant 0 : index
    %13 = vector.load %arg6[%c0_16, %c0_17, %c0_18] : memref<2x32x192xf32, #tpu.memory_space<vmem>>, vector<1x32x192xf32>
    %14 = vector.shape_cast %13 : vector<1x32x192xf32> to vector<32x192xf32>
    %cst_19 = arith.constant dense<0.000000e+00> : vector<32x192xf32>
    %15 = tpu.matmul %12, %14, %cst_19 {dimension_numbers = #tpu.dot_dimension_numbers<[1], [0], [0], [1], [0, 0, 1, 1], [], []>} : vector<32x32xf32>, vector<32x192xf32>, vector<32x192xf32> -> vector<32x192xf32>
    %16 = vector.extract_strided_slice %15 {offsets = [0, 0], sizes = [16, 128], strides = [1, 1]} : vector<32x192xf32> to vector<16x128xf32>
    %17 = vector.extract_strided_slice %15 {offsets = [0, 128], sizes = [16, 32], strides = [1, 1]} : vector<32x192xf32> to vector<16x32xf32>
    %18 = vector.extract_strided_slice %15 {offsets = [0, 160], sizes = [16, 32], strides = [1, 1]} : vector<32x192xf32> to vector<16x32xf32>
    %19 = vector.extract_strided_slice %15 {offsets = [0, 0], sizes = [32, 128], strides = [1, 1]} : vector<32x192xf32> to vector<32x128xf32>
    %c0_20 = arith.constant 0 : index
    %c0_21 = arith.constant 0 : index
    %c0_22 = arith.constant 0 : index
    %20 = vector.load %arg7[%c0_20, %c0_21, %c0_22] : memref<2x128x12xf32, #tpu.memory_space<vmem>>, vector<1x128x12xf32>
    %21 = vector.shape_cast %20 : vector<1x128x12xf32> to vector<128x12xf32>
    %cst_23 = arith.constant dense<0.000000e+00> : vector<32x12xf32>
    %22 = tpu.matmul %19, %21, %cst_23 {dimension_numbers = #tpu.dot_dimension_numbers<[1], [0], [0], [1], [0, 0, 1, 1], [], []>} : vector<32x128xf32>, vector<128x12xf32>, vector<32x12xf32> -> vector<32x12xf32>
    %23 = vector.extract_strided_slice %22 {offsets = [0, 0], sizes = [16, 4], strides = [1, 1]} : vector<32x12xf32> to vector<16x4xf32>
    %24 = vector.extract_strided_slice %22 {offsets = [0, 4], sizes = [16, 4], strides = [1, 1]} : vector<32x12xf32> to vector<16x4xf32>
    %25 = vector.extract_strided_slice %22 {offsets = [16, 8], sizes = [16, 4], strides = [1, 1]} : vector<32x12xf32> to vector<16x4xf32>
    %26 = arith.addf %23, %25 : vector<16x4xf32>
    %27 = tpu.concatenate %26, %24 in 0 : vector<16x4xf32>, vector<16x4xf32> -> vector<32x4xf32>
    %cst_24 = arith.constant dense<0.000000e+00> : vector<24x4xf32>
    %28 = tpu.matmul %0, %27, %cst_24 {dimension_numbers = #tpu.dot_dimension_numbers<[1], [0], [0], [1], [0, 0, 1, 1], [], []>} : vector<24x32xf32>, vector<32x4xf32>, vector<24x4xf32> -> vector<24x4xf32>
    %cst_25 = arith.constant 0.000000e+00 : f32
    %29 = vector.broadcast %cst_25 : f32 to vector<24x4xf32>
    %30 = arith.cmpf ogt, %28, %29 : vector<24x4xf32>
    %cst_26 = arith.constant 2.000000e-01 : f32
    %31 = vector.broadcast %cst_26 : f32 to vector<24x4xf32>
    %32 = arith.mulf %31, %28 : vector<24x4xf32>
    %33 = arith.select %30, %28, %32 : vector<24x4xi1>, vector<24x4xf32>
    %34 = vector.shape_cast %33 : vector<24x4xf32> to vector<1x24x4xf32>
    %cst_27 = arith.constant dense<0xFF800000> : vector<1xf32>
    %35 = vector.multi_reduction <maximumf>, %34, %cst_27 [1, 2] : vector<1x24x4xf32> to vector<1xf32>
    %36 = vector.shape_cast %35 : vector<1xf32> to vector<1x1x1xf32>
    %37 = vector.extract %36[0, 0, 0] : f32 from vector<1x1x1xf32>
    %38 = vector.broadcast %37 : f32 to vector<24x4xf32>
    %39 = arith.subf %33, %38 : vector<24x4xf32>
    %40 = math.exp %39 : vector<24x4xf32>
    %cst_28 = arith.constant dense<0.000000e+00> : vector<16x4xf32>
    %41 = tpu.matmul %2, %40, %cst_28 {dimension_numbers = #tpu.dot_dimension_numbers<[0], [0], [1], [1], [0, 1, 1, 1], [], []>} : vector<24x16xf32>, vector<24x4xf32>, vector<16x4xf32> -> vector<16x4xf32>
    %cst_29 = arith.constant dense<0.000000e+00> : vector<24x4xf32>
    %42 = tpu.matmul %2, %41, %cst_29 {dimension_numbers = #tpu.dot_dimension_numbers<[1], [0], [0], [1], [0, 0, 1, 1], [], []>} : vector<24x16xf32>, vector<16x4xf32>, vector<24x4xf32> -> vector<24x4xf32>
    %43 = arith.divf %40, %42 : vector<24x4xf32>
    %cst_30 = arith.constant dense<0.000000e+00> : vector<24x128xf32>
    %44 = tpu.matmul %1, %16, %cst_30 {dimension_numbers = #tpu.dot_dimension_numbers<[1], [0], [0], [1], [0, 0, 1, 1], [], []>} : vector<24x16xf32>, vector<16x128xf32>, vector<24x128xf32> -> vector<24x128xf32>
    %cst_31 = arith.constant dense<0.000000e+00> : vector<24x128xf32>
    %45 = tpu.matmul %43, %3, %cst_31 {dimension_numbers = #tpu.dot_dimension_numbers<[1], [0], [0], [1], [0, 0, 1, 1], [], []>} : vector<24x4xf32>, vector<4x128xf32>, vector<24x128xf32> -> vector<24x128xf32>
    %46 = arith.mulf %45, %44 : vector<24x128xf32>
    %cst_32 = arith.constant dense<0.000000e+00> : vector<24x32xf32>
    %47 = tpu.matmul %46, %4, %cst_32 {dimension_numbers = #tpu.dot_dimension_numbers<[1], [0], [0], [1], [0, 0, 1, 1], [], []>} : vector<24x128xf32>, vector<128x32xf32>, vector<24x32xf32> -> vector<24x32xf32>
    %cst_33 = arith.constant dense<0.000000e+00> : vector<16x32xf32>
    %48 = tpu.matmul %2, %47, %cst_33 {dimension_numbers = #tpu.dot_dimension_numbers<[0], [0], [1], [1], [0, 1, 1, 1], [], []>} : vector<24x16xf32>, vector<24x32xf32>, vector<16x32xf32> -> vector<16x32xf32>
    %49 = vector.extract_strided_slice %10 {offsets = [0, 0], sizes = [16, 32], strides = [1, 1]} : vector<16x64xf32> to vector<16x32xf32>
    %50 = arith.addf %48, %49 : vector<16x32xf32>
    %cst_34 = arith.constant 0.000000e+00 : f32
    %51 = vector.broadcast %cst_34 : f32 to vector<16x1xf32>
    %52 = arith.cmpf ogt, %5, %51 : vector<16x1xf32>
    %53 = vector.shape_cast %52 : vector<16x1xi1> to vector<16x1xi1>
    %54 = vector.broadcast %53 : vector<16x1xi1> to vector<16x32xi1>
    %55 = arith.select %54, %17, %18 : vector<16x32xi1>, vector<16x32xf32>
    %56 = arith.addf %50, %55 : vector<16x32xf32>
    %cst_35 = arith.constant 0.000000e+00 : f32
    %57 = vector.broadcast %cst_35 : f32 to vector<16x32xf32>
    %58 = arith.maximumf %56, %57 : vector<16x32xf32>
    %59 = tpu.concatenate %58, %6 in 0 : vector<16x32xf32>, vector<16x32xf32> -> vector<32x32xf32>
    %c1 = arith.constant 1 : index
    %c0_36 = arith.constant 0 : index
    %c0_37 = arith.constant 0 : index
    %60 = vector.load %arg6[%c1, %c0_36, %c0_37] : memref<2x32x192xf32, #tpu.memory_space<vmem>>, vector<1x32x192xf32>
    %61 = vector.shape_cast %60 : vector<1x32x192xf32> to vector<32x192xf32>
    %cst_38 = arith.constant dense<0.000000e+00> : vector<32x192xf32>
    %62 = tpu.matmul %59, %61, %cst_38 {dimension_numbers = #tpu.dot_dimension_numbers<[1], [0], [0], [1], [0, 0, 1, 1], [], []>} : vector<32x32xf32>, vector<32x192xf32>, vector<32x192xf32> -> vector<32x192xf32>
    %63 = vector.extract_strided_slice %62 {offsets = [0, 0], sizes = [16, 128], strides = [1, 1]} : vector<32x192xf32> to vector<16x128xf32>
    %64 = vector.extract_strided_slice %62 {offsets = [0, 128], sizes = [16, 32], strides = [1, 1]} : vector<32x192xf32> to vector<16x32xf32>
    %65 = vector.extract_strided_slice %62 {offsets = [0, 160], sizes = [16, 32], strides = [1, 1]} : vector<32x192xf32> to vector<16x32xf32>
    %66 = vector.extract_strided_slice %62 {offsets = [0, 0], sizes = [32, 128], strides = [1, 1]} : vector<32x192xf32> to vector<32x128xf32>
    %c1_39 = arith.constant 1 : index
    %c0_40 = arith.constant 0 : index
    %c0_41 = arith.constant 0 : index
    %67 = vector.load %arg7[%c1_39, %c0_40, %c0_41] : memref<2x128x12xf32, #tpu.memory_space<vmem>>, vector<1x128x12xf32>
    %68 = vector.shape_cast %67 : vector<1x128x12xf32> to vector<128x12xf32>
    %cst_42 = arith.constant dense<0.000000e+00> : vector<32x12xf32>
    %69 = tpu.matmul %66, %68, %cst_42 {dimension_numbers = #tpu.dot_dimension_numbers<[1], [0], [0], [1], [0, 0, 1, 1], [], []>} : vector<32x128xf32>, vector<128x12xf32>, vector<32x12xf32> -> vector<32x12xf32>
    %70 = vector.extract_strided_slice %69 {offsets = [0, 0], sizes = [16, 4], strides = [1, 1]} : vector<32x12xf32> to vector<16x4xf32>
    %71 = vector.extract_strided_slice %69 {offsets = [0, 4], sizes = [16, 4], strides = [1, 1]} : vector<32x12xf32> to vector<16x4xf32>
    %72 = vector.extract_strided_slice %69 {offsets = [16, 8], sizes = [16, 4], strides = [1, 1]} : vector<32x12xf32> to vector<16x4xf32>
    %73 = arith.addf %70, %72 : vector<16x4xf32>
    %74 = tpu.concatenate %73, %71 in 0 : vector<16x4xf32>, vector<16x4xf32> -> vector<32x4xf32>
    %cst_43 = arith.constant dense<0.000000e+00> : vector<24x4xf32>
    %75 = tpu.matmul %0, %74, %cst_43 {dimension_numbers = #tpu.dot_dimension_numbers<[1], [0], [0], [1], [0, 0, 1, 1], [], []>} : vector<24x32xf32>, vector<32x4xf32>, vector<24x4xf32> -> vector<24x4xf32>
    %cst_44 = arith.constant 0.000000e+00 : f32
    %76 = vector.broadcast %cst_44 : f32 to vector<24x4xf32>
    %77 = arith.cmpf ogt, %75, %76 : vector<24x4xf32>
    %cst_45 = arith.constant 2.000000e-01 : f32
    %78 = vector.broadcast %cst_45 : f32 to vector<24x4xf32>
    %79 = arith.mulf %78, %75 : vector<24x4xf32>
    %80 = arith.select %77, %75, %79 : vector<24x4xi1>, vector<24x4xf32>
    %81 = vector.shape_cast %80 : vector<24x4xf32> to vector<1x24x4xf32>
    %cst_46 = arith.constant dense<0xFF800000> : vector<1xf32>
    %82 = vector.multi_reduction <maximumf>, %81, %cst_46 [1, 2] : vector<1x24x4xf32> to vector<1xf32>
    %83 = vector.shape_cast %82 : vector<1xf32> to vector<1x1x1xf32>
    %84 = vector.extract %83[0, 0, 0] : f32 from vector<1x1x1xf32>
    %85 = vector.broadcast %84 : f32 to vector<24x4xf32>
    %86 = arith.subf %80, %85 : vector<24x4xf32>
    %87 = math.exp %86 : vector<24x4xf32>
    %cst_47 = arith.constant dense<0.000000e+00> : vector<16x4xf32>
    %88 = tpu.matmul %2, %87, %cst_47 {dimension_numbers = #tpu.dot_dimension_numbers<[0], [0], [1], [1], [0, 1, 1, 1], [], []>} : vector<24x16xf32>, vector<24x4xf32>, vector<16x4xf32> -> vector<16x4xf32>
    %cst_48 = arith.constant dense<0.000000e+00> : vector<24x4xf32>
    %89 = tpu.matmul %2, %88, %cst_48 {dimension_numbers = #tpu.dot_dimension_numbers<[1], [0], [0], [1], [0, 0, 1, 1], [], []>} : vector<24x16xf32>, vector<16x4xf32>, vector<24x4xf32> -> vector<24x4xf32>
    %90 = arith.divf %87, %89 : vector<24x4xf32>
    %cst_49 = arith.constant dense<0.000000e+00> : vector<24x128xf32>
    %91 = tpu.matmul %1, %63, %cst_49 {dimension_numbers = #tpu.dot_dimension_numbers<[1], [0], [0], [1], [0, 0, 1, 1], [], []>} : vector<24x16xf32>, vector<16x128xf32>, vector<24x128xf32> -> vector<24x128xf32>
    %cst_50 = arith.constant dense<0.000000e+00> : vector<24x128xf32>
    %92 = tpu.matmul %90, %3, %cst_50 {dimension_numbers = #tpu.dot_dimension_numbers<[1], [0], [0], [1], [0, 0, 1, 1], [], []>} : vector<24x4xf32>, vector<4x128xf32>, vector<24x128xf32> -> vector<24x128xf32>
    %93 = arith.mulf %92, %91 : vector<24x128xf32>
    %cst_51 = arith.constant dense<0.000000e+00> : vector<24x32xf32>
    %94 = tpu.matmul %93, %4, %cst_51 {dimension_numbers = #tpu.dot_dimension_numbers<[1], [0], [0], [1], [0, 0, 1, 1], [], []>} : vector<24x128xf32>, vector<128x32xf32>, vector<24x32xf32> -> vector<24x32xf32>
    %cst_52 = arith.constant dense<0.000000e+00> : vector<16x32xf32>
    %95 = tpu.matmul %2, %94, %cst_52 {dimension_numbers = #tpu.dot_dimension_numbers<[0], [0], [1], [1], [0, 1, 1, 1], [], []>} : vector<24x16xf32>, vector<24x32xf32>, vector<16x32xf32> -> vector<16x32xf32>
    %96 = vector.extract_strided_slice %10 {offsets = [0, 32], sizes = [16, 32], strides = [1, 1]} : vector<16x64xf32> to vector<16x32xf32>
    %97 = arith.addf %95, %96 : vector<16x32xf32>
    %cst_53 = arith.constant 0.000000e+00 : f32
    %98 = vector.broadcast %cst_53 : f32 to vector<16x1xf32>
    %99 = arith.cmpf ogt, %5, %98 : vector<16x1xf32>
    %100 = vector.shape_cast %99 : vector<16x1xi1> to vector<16x1xi1>
    %101 = vector.broadcast %100 : vector<16x1xi1> to vector<16x32xi1>
    %102 = arith.select %101, %64, %65 : vector<16x32xi1>, vector<16x32xf32>
    %103 = arith.addf %97, %102 : vector<16x32xf32>
    %cst_54 = arith.constant 0.000000e+00 : f32
    %104 = vector.broadcast %cst_54 : f32 to vector<16x32xf32>
    %105 = arith.maximumf %103, %104 : vector<16x32xf32>
    %c0_55 = arith.constant 0 : index
    %c0_56 = arith.constant 0 : index
    %106 = vector.load %arg11[%c0_55, %c0_56] : memref<17x32xf32, #tpu.memory_space<vmem>>, vector<16x32xf32>
    tpu.vector_store %arg11[%c0_55, %c0_56], %105 {strides = array<i32>} : memref<17x32xf32, #tpu.memory_space<vmem>>, vector<16x32xf32>,
    %c0_57 = arith.constant 0 : index
    %c0_58 = arith.constant 0 : index
    %107 = vector.load %arg5[%c0_57, %c0_58] : memref<1x16xf32, #tpu.memory_space<vmem>>, vector<1x16xf32>
    %cst_59 = arith.constant dense<0.000000e+00> : vector<1x32xf32>
    %108 = tpu.matmul %107, %105, %cst_59 {dimension_numbers = #tpu.dot_dimension_numbers<[1], [0], [0], [1], [0, 0, 1, 1], [], []>} : vector<1x16xf32>, vector<16x32xf32>, vector<1x32xf32> -> vector<1x32xf32>
    %c16 = arith.constant 16 : index
    %c0_60 = arith.constant 0 : index
    %109 = vector.load %arg11[%c16, %c0_60] : memref<17x32xf32, #tpu.memory_space<vmem>>, vector<1x32xf32>
    tpu.vector_store %arg11[%c16, %c0_60], %108 {strides = array<i32>} : memref<17x32xf32, #tpu.memory_space<vmem>>, vector<1x32xf32>,
    return
  }
}

</mosaic_0001>

<bundles_post_ra>
// kernel: aurgcn_forward.1
= control target key start
LH: loop header
LB: loop body
LE: loop exit
PB: predicated region body
PF: predicated region fallthrough
CT: control target
= control target key end

     0   :  { %v2698_v0 = vmov 0.0   ;;  %vm2699_vm0 = vmmov 0   ;;  %vm69_vm1 = vcmask 261120   ;;  %s2700_s26 = smov 112   ;;  %v2701_v53 = vmov 0   ;;  %s2704_s12 = smov 96   ;;  %s3412_s8 = inlined_call_operand.vmem [shape: f32[32,64], index: 8, kind: input, shape index: {}]   ;;  %s3413_s3 = inlined_call_operand.vmem [shape: f32[24,32], index: 3, kind: input, shape index: {}]   ;;  %s3414_s6 = inlined_call_operand.vmem [shape: f32[2,32,192], index: 6, kind: input, shape index: {}]   ;;  %s3415_s7 = inlined_call_operand.vmem [shape: f32[2,128,12], index: 7, kind: input, shape index: {}]   ;;  %s3416_s0 = inlined_call_operand.vmem [shape: f32[16,32], index: 0, kind: input, shape index: {}]   ;;  %s3417_s1 = inlined_call_operand.vmem [shape: f32[16,32], index: 1, kind: input, shape index: {}]   ;;  %s3418_s2 = inlined_call_operand.vmem [shape: f32[24,32], index: 2, kind: input, shape index: {}]   ;;  %s3419_s4 = inlined_call_operand.vmem [shape: f32[16,1], index: 4, kind: input, shape index: {}]   ;;  %s3420_s9 = inlined_call_operand.vmem [shape: f32[4,128], index: 9, kind: input, shape index: {}]   ;;  %s3421_s10 = inlined_call_operand.vmem [shape: f32[128,32], index: 10, kind: input, shape index: {}]   ;;  %s3422_s5 = inlined_call_operand.vmem [shape: f32[1,16], index: 5, kind: input, shape index: {}]   ;;  %s3423_s11 = inlined_call_operand.vmem [shape: f32[17,32], index: 11, kind: output, shape index: {}]  }
   0x1   :  { %2318 = vmatprep.subr.mxu0 %v2698_v0  ;;  %v68_v1 = vld [vmem:[%s3412_s8 + $0x18] sm:$0xff]  ;;  %v67_v2 = vld [vmem:[%s3412_s8 + $0x10] sm:$0xff]  ;;  %2326 = vmatprep.mubr.msk.f32.mxu0 %vm2699_vm0, %v2698_v0  ;;  %v66_v3 = vld [vmem:[%s3412_s8 + $0x8] sm:$0xff]  ;;  %vm203_vm3 = vcmask 195584   ;;  %vm608_vm6 = vcmask 31744   ;;  %vm708_vm9 = vcmask 130048  }
   0x2   :  { %2319 = vmatpush3.msra.mxu0 %v68_v1  ;;  %v65_v4 = vld [vmem:[%s3412_s8] sm:$0xff]  ;;  %v294_v6 = vld [vmem:[%s3414_s6 + $0x38] sm:$0xff]  ;;  %v293_v7 = vld [vmem:[%s3414_s6 + $0x30] sm:$0xff]  ;;  %2672 = vset.pattern.permute.xlu0 %v2701_v53  ;;  %vm896_vm10 = vcmask 1043456  }
   0x3   :  { %2320 = vmatprep.subr.mxu0 %v2698_v0  ;;  %v62_v5 = vld [vmem:[%s3413_s3] sm:$0xff]  ;;  %v292_v8 = vld [vmem:[%s3414_s6 + $0x28] sm:$0xff]  ;;  %v290_v11 = vld [vmem:[%s3414_s6 + $0x18] sm:$0xff] }
   0x4   :  { %2321 = vmatpush3.msra.mxu0 %v67_v2  ;;  %v291_v9 = vld [vmem:[%s3414_s6 + $0x20] sm:$0xff]  ;;  %v63_v10 = vld [vmem:[%s3413_s3 + $0x8] sm:$0xff]  ;;  %v289_v12 = vld [vmem:[%s3414_s6 + $0x10] sm:$0xff] }
   0x5   :  { %2322 = vmatprep.subr.mxu0 %v2698_v0  ;;  %v288_v13 = vld [vmem:[%s3414_s6 + $0x8] sm:$0xff]  ;;  %v287_v14 = vld [vmem:[%s3414_s6] sm:$0xff]  ;;  %v64_v15 = vld [vmem:[%s3413_s3 + $0x10] sm:$0xff] }
   0x6   :  { %2323 = vmatpush3.msra.mxu0 %v66_v3  ;;  %v409_v16 = vld [vmem:[%s3415_s7 + $0x78] sm:$0xff]  ;;  %v285_v17 = vld [vmem:[%s3416_s0] sm:$0xff]  ;;  %v408_v18 = vld [vmem:[%s3415_s7 + $0x70] sm:$0xff] }
   0x7   :  { %2324 = vmatprep.subr.mxu0 %v2698_v0  ;;  %v286_v19 = vld [vmem:[%s3416_s0 + $0x8] sm:$0xff]  ;;  %v406_v21 = vld [vmem:[%s3415_s7 + $0x60] sm:$0xff]  ;;  %v405_v23 = vld [vmem:[%s3415_s7 + $0x58] sm:$0xff] }
   0x8   :  { %2325 = vmatpush3.msra.mxu0 %v65_v4  ;;  %v407_v20 = vld [vmem:[%s3415_s7 + $0x68] sm:$0xff]  ;;  %v2849_v22 = vld [vmem:[%s3417_s1] sm:$0xff]  ;;  %v404_v24 = vld [vmem:[%s3415_s7 + $0x50] sm:$0xff] }
   0x9   :  { %2327 = vmatmul.mubr.msk.f32.vlgmr.msra.gmra.mxu0 %vm69_vm1, %v62_v5  ;;  %331 = vmatprep.subr.mxu0 %v294_v6  ;;  %v2863_v25 = vld [vmem:[%s3417_s1 + $0x8] sm:$0xff]  ;;  %v402_v27 = vld [vmem:[%s3415_s7 + $0x40] sm:$0xff]  ;;  %v401_v28 = vld [vmem:[%s3415_s7 + $0x38] sm:$0xff]  ;;  %s2703_s1 = smov 120  }
   0xa   :  { %2329 = vmatprep.mubr.msk.f32.mxu0 %vm2699_vm0, %v2698_v0  ;;  %332 = vmatpush1.msra.mxu0 %v293_v7  ;;  %v403_v26 = vld [vmem:[%s3415_s7 + $0x48] sm:$0xff]  ;;  %v400_v29 = vld [vmem:[%s3415_s7 + $0x30] sm:$0xff]  ;;  %v398_v31 = vld [vmem:[%s3415_s7 + $0x20] sm:$0xff] }
   0xb   :  { %333 = vmatprep.subr.mxu0 %v292_v8  ;;  %v399_v30 = vld [vmem:[%s3415_s7 + $0x28] sm:$0xff]  ;;  %v397_v32 = vld [vmem:[%s3415_s7 + $0x18] sm:$0xff]  ;;  %v396_v33 = vld [vmem:[%s3415_s7 + $0x10] sm:$0xff] }
   0xc   :  { %334 = vmatpush1.msra.mxu0 %v291_v9  ;;  %v395_v34 = vld [vmem:[%s3415_s7 + $0x8] sm:$0xff]  ;;  %v394_v35 = vld [vmem:[%s3415_s7] sm:$0xff]  ;;  %v2906_v37 = vld [vmem:[%s3418_s2 + $0x10] sm:$0xff] }
   0xd   :  { %2330 = vmatmul.mubr.msk.f32.gmra.mxu0 %vm69_vm1, %v63_v10  ;;  %335 = vmatprep.subr.mxu0 %v290_v11  ;;  %v2901_v36 = vld [vmem:[%s3418_s2] sm:$0xff]  ;;  %v2913_v38 = vld [vmem:[%s3418_s2 + $0x8] sm:$0xff]  ;;  %s2702_s2 = smov 124  }
   0xe   :  { %2332 = vmatprep.mubr.msk.f32.mxu0 %vm2699_vm0, %v2698_v0  ;;  %336 = vmatpush1.msra.mxu0 %v289_v12  ;;  %v59_v61 = vld [vmem:[%s3419_s4 + $0x8] sm:$0xff] }
   0xf   :  { %337 = vmatprep.subr.mxu0 %v288_v13  ;;  %162 = vrot.lane.b32.xlu0 %v2901_v36, %s2700_s26  ;;  %vm1139_vm2 = vcmp.gt.f32.partialorder %v59_v61, 0.0  ;;  %v3044_v61 = vld [vmem:[%s3421_s10 + $0x70] sm:$0xff] }
  0x10   :  { %338 = vmatpush1.msra.mxu0 %v287_v14  ;;  %166 = vrot.lane.b32.xlu1 %v2906_v37, %s2700_s26  ;;  %v1141_v62 = vsel %vm1139_vm2, 1, %v2701_v53 }
  0x11   :  { %2333 = vmatmul.mubr.msk.f32.gmra.mxu0 %vm69_vm1, %v64_v15  ;;  %2344 = vmatprep.subr.mxu0 %v409_v16 }
  0x12   :  { %371 = vmatprep.mubr.f32.mxu0 %v2698_v0 }
  0x13   :  { %164 = vrot.lane.b32.xlu0 %v2913_v38, %s2700_s26 }
  0x15   :  { %2096 = vmatmul.mubr.msk.f32.vlgmr.msra.gmra.mxu0 %vm69_vm1, %v285_v17 }
  0x16   :  { %377 = vmatprep.mubr.f32.mxu0 %v2698_v0  ;;  %2345 = vmatpush3.msra.mxu0 %v409_v16 }
  0x17   :  { %2346 = vmatprep.subr.mxu0 %v408_v18 }
  0x18   :  { %2347 = vmatpush3.msra.mxu0 %v408_v18 }
  0x19   :  { %2097 = vmatmul.mubr.msk.f32.gmra.mxu0 %vm69_vm1, %v286_v19  ;;  %2348 = vmatprep.subr.mxu0 %v407_v20 }
  0x1a   :  { %383 = vmatprep.mubr.f32.mxu0 %v2698_v0  ;;  %2349 = vmatpush3.msra.mxu0 %v407_v20 }
  0x1b   :  { %2350 = vmatprep.subr.mxu0 %v406_v21 }
  0x1c   :  { %2351 = vmatpush3.msra.mxu0 %v406_v21 }
  0x1d   :  { %2098 = vmatmul.mubr.msk.f32.gmra.mxu0 %vm69_vm1, %v2849_v22  ;;  %2352 = vmatprep.subr.mxu0 %v405_v23 }
  0x1e   :  { %388 = vmatprep.mubr.f32.mxu0 %v2698_v0  ;;  %2353 = vmatpush3.msra.mxu0 %v405_v23 }
  0x1f   :  { %2354 = vmatprep.subr.mxu0 %v404_v24 }
  0x20   :  { %2355 = vmatpush3.msra.mxu0 %v404_v24 }
  0x21   :  { %2099 = vmatmul.mubr.msk.f32.gmra.mxu0 %vm69_vm1, %v2863_v25  ;;  %2356 = vmatprep.subr.mxu0 %v403_v26 }
  0x22   :  { %2357 = vmatpush3.msra.mxu0 %v403_v26 }
  0x23   :  { %2358 = vmatprep.subr.mxu0 %v402_v27 }
  0x24   :  { %2359 = vmatpush3.msra.mxu0 %v402_v27 }
  0x25   :  { %2360 = vmatprep.subr.mxu0 %v401_v28 }
  0x26   :  { %2361 = vmatpush3.msra.mxu0 %v401_v28 }
  0x27   :  { %2362 = vmatprep.subr.mxu0 %v400_v29 }
  0x28   :  { %2363 = vmatpush3.msra.mxu0 %v400_v29  ;;  %v58_v29 = vld [vmem:[%s3419_s4] sm:$0xff] }
  0x29   :  { %2364 = vmatprep.subr.mxu0 %v399_v30  ;;  %vm1138_vm8 = vcmp.gt.f32.partialorder %v58_v29, 0.0 }
  0x2a   :  { %2365 = vmatpush3.msra.mxu0 %v399_v30  ;;  %v1140_v30 = vsel %vm1138_vm8, 1, %v2701_v53 }
  0x2b   :  { %2366 = vmatprep.subr.mxu0 %v398_v31 }
  0x2c   :  { %2367 = vmatpush3.msra.mxu0 %v398_v31 }
  0x2d   :  { %2368 = vmatprep.subr.mxu0 %v397_v32 }
  0x2e   :  { %2369 = vmatpush3.msra.mxu0 %v397_v32 }
  0x2f   :  { %2370 = vmatprep.subr.mxu0 %v396_v33 }
  0x30   :  { %2371 = vmatpush3.msra.mxu0 %v396_v33 }
  0x31   :  { %2372 = vmatprep.subr.mxu0 %v395_v34 }
  0x32   :  { %2373 = vmatpush3.msra.mxu0 %v395_v34 }
  0x33   :  { %2374 = vmatprep.subr.mxu0 %v394_v35 }
  0x34   :  { %2375 = vmatpush3.msra.mxu0 %v394_v35 }
  0x35   :  { %2421 = vmatprep.subr.mxu0 %v2698_v0 }
  0x81   :  { %v2930_v58 = vpop.permute.xlu0 %162 }
  0x82   :  { %v2936_v60 = vpop.permute.xlu1 %166 }
  0x85   :  { %v2933_v59 = vpop.permute.xlu0 %164 }
  0xc9   :  { %v145_v39 = vpop.f32.mrf.mxu0 }
  0xcb   :  { %v2328_v40 = vpop.f32.mrf.mxu0 }
  0xcd   :  { %v150_v41 = vpop.f32.mrf.mxu0 }
  0xcf   :  { %v2331_v42 = vpop.f32.mrf.mxu0 }
  0xd1   :  { %v155_v43 = vpop.f32.mrf.mxu0 }
  0xd2   :  { %2335 = vmatprep.subr.mxu1 %v155_v43 }
  0xd3   :  { %v2334_v44 = vpop.f32.mrf.mxu0  ;;  %2336 = vmatpush3.msra.mxu1 %v155_v43 }
  0xd4   :  { %2337 = vmatprep.subr.mxu1 %v150_v41 }
  0xd5   :  { %2338 = vmatpush3.msra.mxu1 %v150_v41  ;;  %v373_v45 = vpop.f32.mrf.mxu0 }
  0xd6   :  { %2339 = vmatprep.subr.mxu1 %v145_v39  ;;  %2376 = vmatprep.mubr.f32.mxu0 %v373_v45 }
  0xd7   :  { %2340 = vmatpush3.msra.mxu1 %v145_v39  ;;  %v2916_v46 = vpop.f32.mrf.mxu0 }
  0xd8   :  { %2382 = vmatprep.subr.mxu1 %v2698_v0 }
  0xd9   :  { %v379_v47 = vpop.f32.mrf.mxu0 }
  0xda   :  { %2377 = vmatmul.mubr.f32.vlgmr.msra.gmra.mxu0 %v379_v47 }
  0xdb   :  { %2422 = vmatpush3.msra.mxu0 %v379_v47  ;;  %v2919_v48 = vpop.f32.mrf.mxu0 }
  0xdc   :  { %2423 = vmatprep.subr.mxu0 %v2698_v0 }
  0xdd   :  { %2424 = vmatpush3.msra.mxu0 %v373_v45  ;;  %v385_v49 = vpop.f32.mrf.mxu0 }
  0xde   :  { %2379 = vmatprep.mubr.f32.mxu0 %v385_v49  ;;  %2445 = vmatprep.subr.mxu0 %v2698_v0 }
  0xdf   :  { %v387_v50 = vpop.f32.mrf.mxu0 }
  0xe1   :  { %v390_v51 = vpop.f32.mrf.mxu0 }
  0xe2   :  { %2380 = vmatmul.mubr.f32.gmra.mxu0 %v390_v51 }
  0xe3   :  { %v392_v52 = vpop.f32.mrf.mxu0  ;;  %2425 = vmatprep.mubr.msk.f32.mxu0 %vm2699_vm0, %v2698_v0 }
  0xe6   :  { %2426 = vmatmul.mubr.msk.f32.vlgmr.msra.gmra.mxu0 %vm708_vm9, %v2901_v36 }
  0xe7   :  { %2428 = vmatprep.mubr.msk.f32.mxu0 %vm2699_vm0, %v2698_v0 }
  0xea   :  { %2429 = vmatmul.mubr.msk.f32.gmra.mxu0 %vm708_vm9, %v2913_v38 }
  0xeb   :  { %2431 = vmatprep.mubr.msk.f32.mxu0 %vm2699_vm0, %v2698_v0 }
  0xee   :  { %2432 = vmatmul.mubr.msk.f32.gmra.mxu0 %vm708_vm9, %v2906_v37 }
  0xef   :  { %2477 = vmatprep.mubr.msk.f32.mxu0 %vm2699_vm0, %v2698_v0 }
 0x19a   :  { %v2378_v54 = vpop.f32.mrf.mxu0 }
 0x19b   :  { %509 = vrot.lane.b32.xlu1 %v2378_v54, %s2702_s2 }
 0x19c   :  { %v476_v55 = vpop.f32.mrf.mxu0 }
 0x19f   :  { %507 = vrot.lane.b32.xlu1 %v476_v55, %s2702_s2 }
 0x1a2   :  { %v2381_v56 = vpop.f32.mrf.mxu0 }
 0x1a3   :  { %499 = vrot.lane.b32.xlu0 %v2381_v56, %s2703_s1 }
 0x1a4   :  { %v486_v57 = vpop.f32.mrf.mxu0 }
 0x1a6   :  { %v3034_v56 = vpop.f32.mrf.mxu0 }
 0x1a7   :  { %497 = vrot.lane.b32.xlu0 %v486_v57, %s2703_s1  ;;  %v3039_v57 = vld [vmem:[%s3421_s10 + $0x78] sm:$0xff] }
 0x1a8   :  { %2446 = vmatpush3.msra.mxu0 %v3039_v57 }
 0x1a9   :  { %2447 = vmatprep.subr.mxu0 %v2698_v0 }
 0x1aa   :  { %2448 = vmatpush3.msra.mxu0 %v3044_v61 }
 0x1ab   :  { %2449 = vmatprep.subr.mxu0 %v2698_v0 }
 0x1c8   :  { %171 = vxpose.xlu1.b32.start [1/3] (short) (narrow) %v2930_v58, 16 }
 0x1cc   :  { %172 = vxpose.xlu1.b32.cont [2/3] (short) (narrow) %v2933_v59, 16 }
 0x1d0   :  { %173 = vxpose.xlu1.b32.end [3/3] (short) (narrow) %v2936_v60, 16 }
 0x1ee   :  { %2673 = vset.pattern.permute.xlu1 %v2701_v53 }
 0x1ef   :  { %1146 = vperm.xlu1 %2673, %v1141_v62   ;;  %v2427_v62 = vpop.f32.mrf.mxu0 }
 0x1f0   :  { %v2124_v62 = vld [vmem:[%s3414_s6 + $0x78] sm:$0xff] }
 0x1f3   :  { %1154 = vrot.lane.b32.xlu1 %v2919_v48, %s2704_s12 }
 0x20d   :  { %v510_v63 = vpop.permute.xlu1 %509 }
 0x211   :  { %v508_v1 = vpop.permute.xlu1 %507 }
 0x215   :  { %v500_v3 = vpop.permute.xlu0 %499 }
 0x216   :  { %v504_v6 = vadd.f32 %v2378_v54, %v500_v3  ;;  %v3065_v3 = vld [vmem:[%s3421_s10 + $0x58] sm:$0xff] }
 0x219   :  { %v498_v5 = vpop.permute.xlu0 %497 }
 0x21a   :  { %v503_v7 = vadd.f32 %v498_v5, %v476_v55  ;;  %v3030_v55 = vld [vmem:[%s3420_s9] sm:$0xf]  ;;  %v3072_v5 = vld [vmem:[%s3421_s10 + $0x50] sm:$0xff] }
 0x244   :  { %v2946_v2 = vpop.trf.xlu1 }
 0x245   :  { %2341 = vmatprep.mubr.msk.f32.mxu1 %vm203_vm3, %v2946_v2 }
 0x248   :  { %v2950_v4 = vpop.trf.xlu1 }
 0x249   :  { %2342 = vmatmul.mubr.msk.f32.vlgmr.msra.gmra.mxu1 %vm203_vm3, %v2950_v4 }
 0x24a   :  { %2383 = vmatpush3.msra.mxu1 %v510_v63  ;;  %2390 = vmatprep.mubr.msk.f32.mxu1 %vm2699_vm0, %v2698_v0  ;;  %v3051_v63 = vld [vmem:[%s3421_s10 + $0x68] sm:$0xff] }
 0x24b   :  { %2384 = vmatprep.subr.mxu1 %v2698_v0  ;;  %2450 = vmatpush3.msra.mxu0 %v3051_v63 }
 0x24c   :  { %2385 = vmatpush3.msra.mxu1 %v508_v1  ;;  %v3058_v1 = vld [vmem:[%s3421_s10 + $0x60] sm:$0xff]  ;;  %2451 = vmatprep.subr.mxu0 %v2698_v0 }
 0x24d   :  { %2386 = vmatprep.subr.mxu1 %v2698_v0  ;;  %2452 = vmatpush3.msra.mxu0 %v3058_v1 }
 0x24e   :  { %2387 = vmatpush3.msra.mxu1 %v504_v6  ;;  %2453 = vmatprep.subr.mxu0 %v2698_v0  ;;  %v3079_v6 = vld [vmem:[%s3421_s10 + $0x48] sm:$0xff] }
 0x24f   :  { %2388 = vmatprep.subr.mxu1 %v2698_v0  ;;  %2454 = vmatpush3.msra.mxu0 %v3065_v3 }
 0x250   :  { %2389 = vmatpush3.msra.mxu1 %v503_v7  ;;  %2455 = vmatprep.subr.mxu0 %v2698_v0  ;;  %v3086_v7 = vld [vmem:[%s3421_s10 + $0x40] sm:$0xff] }
 0x251   :  { %2391 = vmatmul.mubr.msk.f32.vlgmr.msra.gmra.mxu1 %vm69_vm1, %v2901_v36  ;;  %2456 = vmatpush3.msra.mxu0 %v3072_v5 }
 0x252   :  { %2393 = vmatprep.mubr.msk.f32.mxu1 %vm2699_vm0, %v2698_v0  ;;  %2457 = vmatprep.subr.mxu0 %v2698_v0 }
 0x253   :  { %2458 = vmatpush3.msra.mxu0 %v3079_v6 }
 0x254   :  { %2459 = vmatprep.subr.mxu0 %v2698_v0 }
 0x255   :  { %2394 = vmatmul.mubr.msk.f32.gmra.mxu1 %vm69_vm1, %v2913_v38  ;;  %2460 = vmatpush3.msra.mxu0 %v3086_v7 }
 0x256   :  { %2396 = vmatprep.mubr.msk.f32.mxu1 %vm2699_vm0, %v2698_v0  ;;  %2461 = vmatprep.subr.mxu0 %v2698_v0 }
 0x259   :  { %2397 = vmatmul.mubr.msk.f32.gmra.mxu1 %vm69_vm1, %v2906_v37 }
 0x25a   :  { %2405 = vmatprep.mubr.msk.f32.mxu1 %vm203_vm3, %v2946_v2 }
 0x309   :  { %v2971_v8 = vpop.f32.mrf.mxu1 }
 0x30b   :  { %v2973_v9 = vpop.f32.mrf.mxu1 }
 0x311   :  { %v585_v10 = vpop.f32.mrf.mxu1 }
 0x312   :  { %v602_v12 = vmul.f32 0.2, %v585_v10  ;;  %vm599_vm4 = vcmp.gt.f32.partialorder %v585_v10, 0.0 }
 0x313   :  { %v2392_v11 = vpop.f32.mrf.mxu1 }
 0x314   :  { %v605_v16 = vsel %vm599_vm4, %v585_v10, %v602_v12  ;;  %v3093_v10 = vld [vmem:[%s3421_s10 + $0x38] sm:$0xff]  ;;  %v3100_v11 = vld [vmem:[%s3421_s10 + $0x30] sm:$0xff]  ;;  %v3107_v12 = vld [vmem:[%s3421_s10 + $0x28] sm:$0xff] }
 0x315   :  { %v590_v13 = vpop.f32.mrf.mxu1  ;;  %v609_v23 = vsel %vm608_vm6, %v605_v16, -inf  ;;  %2462 = vmatpush3.msra.mxu0 %v3093_v10 }
 0x316   :  { %vm600_vm5 = vcmp.gt.f32.partialorder %v590_v13, 0.0  ;;  %v603_v14 = vmul.f32 0.2, %v590_v13  ;;  %2463 = vmatprep.subr.mxu0 %v2698_v0 }
 0x317   :  { %v2395_v15 = vpop.f32.mrf.mxu1  ;;  %2464 = vmatpush3.msra.mxu0 %v3100_v11 }
 0x318   :  { %v606_v17 = vsel %vm600_vm5, %v590_v13, %v603_v14  ;;  %2465 = vmatprep.subr.mxu0 %v2698_v0  ;;  %v3114_v13 = vld [vmem:[%s3421_s10 + $0x20] sm:$0xff]  ;;  %v3121_v14 = vld [vmem:[%s3421_s10 + $0x18] sm:$0xff]  ;;  %v3128_v15 = vld [vmem:[%s3421_s10 + $0x10] sm:$0xff] }
 0x319   :  { %v595_v18 = vpop.f32.mrf.mxu1  ;;  %v610_v19 = vsel %vm608_vm6, %v606_v17, -inf  ;;  %2466 = vmatpush3.msra.mxu0 %v3107_v12 }
 0x31a   :  { %vm601_vm7 = vcmp.gt.f32.partialorder %v595_v18, 0.0  ;;  %v604_v20 = vmul.f32 0.2, %v595_v18  ;;  %v612_v26 = vmax.f32 %v609_v23, %v610_v19  ;;  %2467 = vmatprep.subr.mxu0 %v2698_v0 }
 0x31b   :  { %v2398_v21 = vpop.f32.mrf.mxu1  ;;  %2468 = vmatpush3.msra.mxu0 %v3114_v13 }
 0x31c   :  { %v607_v24 = vsel %vm601_vm7, %v595_v18, %v604_v20  ;;  %2469 = vmatprep.subr.mxu0 %v2698_v0 }
 0x31d   :  { %v611_v27 = vsel %vm608_vm6, %v607_v24, -inf  ;;  %2470 = vmatpush3.msra.mxu0 %v3121_v14 }
 0x31e   :  { %v613_v28 = vmax.f32 %v612_v26, %v611_v27  ;;  %2471 = vmatprep.subr.mxu0 %v2698_v0 }
 0x31f   :  { %2472 = vmatpush3.msra.mxu0 %v3128_v15 }
 0x320   :  { %614 = vmax.xlane.f32.xlu0 %v613_v28  ;;  %2473 = vmatprep.subr.mxu0 %v2698_v0 }
 0x336   :  { %1143 = vperm.xlu0 %2672, %v1140_v30   ;;  %v3149_v30 = vld [vmem:[%s3421_s10 + $0x8] sm:$0xff] }
 0x337   :  { %2474 = vmatpush3.msra.mxu0 %v3149_v30 }
 0x338   :  { %2475 = vmatprep.subr.mxu0 %v2698_v0 }
 0x33a   :  { %1152 = vrot.lane.b32.xlu0 %v2916_v46, %s2704_s12 }
 0x3a9   :  { %v615_v31 = vpop.xlane.xlu0 %614 }
 0x3aa   :  { %v616_v32 = vrot.slane %v615_v31, 4 }
 0x3ac   :  { %v617_v33 = vmax.f32 %v615_v31, %v616_v32  ;;  %v878_v31 = vpop.f32.mrf.mxu0  ;;  %v3156_v32 = vld [vmem:[%s3421_s10] sm:$0xff] }
 0x3ad   :  { %2476 = vmatpush3.msra.mxu0 %v3156_v32 }
 0x3ae   :  { %v618_v34 = vrot.slane %v617_v33, 2  ;;  %2533 = vmatprep.subr.mxu0 %v2698_v0 }
 0x3b0   :  { %v619_v35 = vmax.f32 %v617_v33, %v618_v34  ;;  %v2430_v33 = vpop.f32.mrf.mxu0 }
 0x3b2   :  { %v620_v39 = vrot.slane %v619_v35, 1  ;;  %v883_v34 = vpop.f32.mrf.mxu0 }
 0x3b4   :  { %v621_v40 = vmax.f32 %v619_v35, %v620_v39  ;;  %v2433_v35 = vpop.f32.mrf.mxu0 }
 0x3b6   :  { %2661 = vpush %v621_v40 }
 0x3e7   :  { %s2662_s8 = spop %2661 }
 0x3e8   :  { %v623_v41 = vstv %s2662_s8 }
 0x3e9   :  { %v625_v42 = vsub.f32 %v606_v17, %v623_v41  ;;  %v626_v43 = vsub.f32 %v607_v24, %v623_v41  ;;  %v624_v44 = vsub.f32 %v605_v16, %v623_v41 }
 0x3eb   :  { %v631_v45 = vmul.f32 1.442695, %v626_v43  ;;  %v629_v47 = vmul.f32 1.442695, %v625_v42  ;;  %v627_v49 = vmul.f32 1.442695, %v624_v44 }
 0x3ed   :  { %2674 = vpow2.f32 %v631_v45 }
 0x3ee   :  { %2676 = vpow2.f32 %v629_v47 }
 0x3ef   :  { %2678 = vpow2.f32 %v627_v49 }
 0x3fa   :  { %v2984_v50 = vpop.eup %2674 }
 0x3fb   :  { %2399 = vmatprep.subr.mxu1 %v2984_v50  ;;  %v2987_v51 = vpop.eup %2676 }
 0x3fc   :  { %2400 = vmatpush3.msra.mxu1 %v2984_v50  ;;  %v2991_v52 = vpop.eup %2678 }
 0x3fd   :  { %2401 = vmatprep.subr.mxu1 %v2987_v51 }
 0x3fe   :  { %2402 = vmatpush3.msra.mxu1 %v2987_v51 }
 0x3ff   :  { %2403 = vmatprep.subr.mxu1 %v2991_v52 }
 0x400   :  { %2404 = vmatpush3.msra.mxu1 %v2991_v52 }
 0x401   :  { %2406 = vmatmul.mubr.msk.f32.vlgmr.msra.gmra.mxu1 %vm203_vm3, %v2950_v4  ;;  %2408 = vmatprep.subr.mxu1 %v2698_v0 }
 0x402   :  { %2412 = vmatprep.mubr.msk.f32.mxu1 %vm2699_vm0, %v2698_v0 }
 0x4c1   :  { %v2407_v53 = vpop.f32.mrf.mxu1 }
 0x4c2   :  { %2409 = vmatpush3.msra.mxu1 %v2407_v53 }
 0x4c3   :  { %v699_v54 = vpop.f32.mrf.mxu1  ;;  %2410 = vmatprep.subr.mxu1 %v2698_v0 }
 0x4c4   :  { %2411 = vmatpush3.msra.mxu1 %v699_v54 }
 0x4c5   :  { %2413 = vmatmul.mubr.msk.f32.vlgmr.msra.gmra.mxu1 %vm708_vm9, %v2930_v58  ;;  %2434 = vmatprep.subr.mxu1 %v2698_v0 }
 0x4c6   :  { %2415 = vmatprep.mubr.msk.f32.mxu1 %vm2699_vm0, %v2698_v0  ;;  %2435 = vmatpush3.msk.msra.mxu1 %vm896_vm10, %v3030_v55 }
 0x4c9   :  { %2416 = vmatmul.mubr.msk.f32.gmra.mxu1 %vm708_vm9, %v2933_v59 }
 0x4ca   :  { %2418 = vmatprep.mubr.msk.f32.mxu1 %vm2699_vm0, %v2698_v0 }
 0x4cd   :  { %2419 = vmatmul.mubr.msk.f32.gmra.mxu1 %vm708_vm9, %v2936_v60 }
 0x4ce   :  { %2436 = vmatprep.mubr.msk.f32.mxu1 %vm2699_vm0, %v2698_v0 }
 0x585   :  { %v781_v16 = vpop.f32.mrf.mxu1 }
 0x586   :  { %2680 = vrcp.f32 %v781_v16  ;;  %v2123_v16 = vld [vmem:[%s3414_s6 + $0x70] sm:$0xff] }
 0x587   :  { %v2414_v17 = vpop.f32.mrf.mxu1 }
 0x588   :  { %v2122_v17 = vld [vmem:[%s3414_s6 + $0x68] sm:$0xff] }
 0x589   :  { %v786_v18 = vpop.f32.mrf.mxu1 }
 0x58a   :  { %2682 = vrcp.f32 %v786_v18  ;;  %v2121_v18 = vld [vmem:[%s3414_s6 + $0x60] sm:$0xff] }
 0x58b   :  { %v2417_v19 = vpop.f32.mrf.mxu1 }
 0x58c   :  { %v2120_v19 = vld [vmem:[%s3414_s6 + $0x58] sm:$0xff] }
 0x58d   :  { %v791_v20 = vpop.f32.mrf.mxu1 }
 0x58e   :  { %2684 = vrcp.f32 %v791_v20  ;;  %v2119_v20 = vld [vmem:[%s3414_s6 + $0x50] sm:$0xff] }
 0x58f   :  { %v2420_v21 = vpop.f32.mrf.mxu1 }
 0x590   :  { %v2118_v21 = vld [vmem:[%s3414_s6 + $0x48] sm:$0xff] }
 0x593   :  { %v2681_v23 = vpop.eup %2680 }
 0x594   :  { %v796_v24 = vmul.f32 %v2681_v23, %v2991_v52  ;;  %v2117_v23 = vld [vmem:[%s3414_s6 + $0x40] sm:$0xff] }
 0x596   :  { %2437 = vmatmul.mubr.msk.f32.vlgmr.msra.gmra.mxu1 %vm608_vm6, %v796_v24  ;;  %v2144_v24 = vld [vmem:[%s3415_s7 + $0xf8] sm:$0xff] }
 0x597   :  { %v2683_v26 = vpop.eup %2682  ;;  %2439 = vmatprep.mubr.msk.f32.mxu1 %vm2699_vm0, %v2698_v0 }
 0x598   :  { %v798_v27 = vmul.f32 %v2683_v26, %v2987_v51  ;;  %v3197_v26 = vpop.permute.xlu0 %1143 }
 0x599   :  { %vm1148_vm11 = vcmp.eq.s32.totalorder %v3197_v26, 1 }
 0x59a   :  { %2440 = vmatmul.mubr.msk.f32.gmra.mxu1 %vm608_vm6, %v798_v27  ;;  %v3199_v27 = vpop.permute.xlu1 %1146 }
 0x59b   :  { %v2685_v28 = vpop.eup %2684  ;;  %2442 = vmatprep.mubr.msk.f32.mxu1 %vm2699_vm0, %v2698_v0  ;;  %vm1149_vm12 = vcmp.eq.s32.totalorder %v3199_v27, 1 }
 0x59c   :  { %v800_v29 = vmul.f32 %v2685_v28, %v2984_v50 }
 0x59e   :  { %2443 = vmatmul.mubr.msk.f32.gmra.mxu1 %vm608_vm6, %v800_v29  ;;  %v1153_v29 = vpop.permute.xlu0 %1152  ;;  %v1155_v33 = vpop.permute.xlu1 %1154 }
 0x59f   :  { %2492 = vmatprep.mubr.msk.f32.mxu1 %vm203_vm3, %v2946_v2 }
 0x656   :  { %v966_v39 = vpop.f32.mrf.mxu1 }
 0x657   :  { %v980_v40 = vmul.f32 %v966_v39, %v3034_v56  ;;  %v1158_v39 = vsel %vm1148_vm11, %v2916_v46, %v1153_v29  ;;  %v2142_v46 = vld [vmem:[%s3415_s7 + $0xe8] sm:$0xff] }
 0x658   :  { %v2438_v41 = vpop.f32.mrf.mxu1 }
 0x659   :  { %2478 = vmatmul.mubr.f32.vlgmr.msra.gmra.mxu0 %v980_v40  ;;  %v1159_v41 = vsel %vm1149_vm12, %v2919_v48, %v1155_v33  ;;  %v2141_v48 = vld [vmem:[%s3415_s7 + $0xe0] sm:$0xff] }
 0x65a   :  { %v971_v42 = vpop.f32.mrf.mxu1  ;;  %2480 = vmatprep.mubr.msk.f32.mxu0 %vm2699_vm0, %v2698_v0 }
 0x65b   :  { %v981_v43 = vmul.f32 %v971_v42, %v878_v31 }
 0x65c   :  { %v2441_v44 = vpop.f32.mrf.mxu1 }
 0x65d   :  { %2481 = vmatmul.mubr.f32.gmra.mxu0 %v981_v43  ;;  %v2143_v44 = vld [vmem:[%s3415_s7 + $0xf0] sm:$0xff] }
 0x65e   :  { %v976_v45 = vpop.f32.mrf.mxu1  ;;  %2483 = vmatprep.mubr.msk.f32.mxu0 %vm2699_vm0, %v2698_v0 }
 0x65f   :  { %v982_v47 = vmul.f32 %v976_v45, %v883_v34 }
 0x660   :  { %v2444_v49 = vpop.f32.mrf.mxu1 }
 0x661   :  { %2484 = vmatmul.mubr.f32.gmra.mxu0 %v982_v47  ;;  %v2140_v47 = vld [vmem:[%s3415_s7 + $0xd8] sm:$0xff]  ;;  %v2139_v49 = vld [vmem:[%s3415_s7 + $0xd0] sm:$0xff] }
 0x662   :  { %2541 = vmatprep.mubr.msk.f32.mxu0 %vm2699_vm0, %v2698_v0 }
 0x719   :  { %v1049_v50 = vpop.f32.mrf.mxu0 }
 0x71b   :  { %v2479_v51 = vpop.f32.mrf.mxu0 }
 0x71c   :  { %v2137_v51 = vld [vmem:[%s3415_s7 + $0xc0] sm:$0xff] }
 0x71d   :  { %v1054_v52 = vpop.f32.mrf.mxu0 }
 0x71f   :  { %v2482_v53 = vpop.f32.mrf.mxu0 }
 0x720   :  { %v2134_v53 = vld [vmem:[%s3415_s7 + $0xa8] sm:$0xff] }
 0x721   :  { %v1059_v54 = vpop.f32.mrf.mxu0 }
 0x722   :  { %2486 = vmatprep.subr.mxu1 %v1059_v54 }
 0x723   :  { %v2485_v56 = vpop.f32.mrf.mxu0  ;;  %2487 = vmatpush3.msra.mxu1 %v1059_v54  ;;  %v2132_v54 = vld [vmem:[%s3415_s7 + $0x98] sm:$0xff] }
 0x724   :  { %2488 = vmatprep.subr.mxu1 %v1054_v52  ;;  %v2131_v56 = vld [vmem:[%s3415_s7 + $0x90] sm:$0xff] }
 0x725   :  { %2489 = vmatpush3.msra.mxu1 %v1054_v52  ;;  %v2135_v52 = vld [vmem:[%s3415_s7 + $0xb0] sm:$0xff] }
 0x726   :  { %2490 = vmatprep.subr.mxu1 %v1049_v50 }
 0x727   :  { %2491 = vmatpush3.msra.mxu1 %v1049_v50  ;;  %v2138_v50 = vld [vmem:[%s3415_s7 + $0xc8] sm:$0xff] }
 0x728   :  { %2493 = vmatmul.mubr.msk.f32.vlgmr.msra.gmra.mxu1 %vm203_vm3, %v2950_v4  ;;  %1203 = vmatprep.subr.mxu1 %v2124_v62  ;;  %v2130_v62 = vld [vmem:[%s3415_s7 + $0x88] sm:$0xff] }
 0x729   :  { %1243 = vmatprep.mubr.f32.mxu1 %v2698_v0  ;;  %1204 = vmatpush1.msra.mxu1 %v2123_v16  ;;  %v2129_v16 = vld [vmem:[%s3415_s7 + $0x80] sm:$0xff] }
 0x72a   :  { %1205 = vmatprep.subr.mxu1 %v2122_v17 }
 0x72b   :  { %1206 = vmatpush1.msra.mxu1 %v2121_v18 }
 0x72c   :  { %1207 = vmatprep.subr.mxu1 %v2120_v19 }
 0x72d   :  { %1208 = vmatpush1.msra.mxu1 %v2119_v20 }
 0x72e   :  { %1209 = vmatprep.subr.mxu1 %v2118_v21 }
 0x72f   :  { %1210 = vmatpush1.msra.mxu1 %v2117_v23 }
 0x730   :  { %2495 = vmatprep.subr.mxu1 %v2144_v24 }
 0x7e8   :  { %v2494_v28 = vpop.f32.mrf.mxu1 }
 0x7e9   :  { %v1135_v34 = vadd.f32 %v2494_v28, %v2971_v8 }
 0x7ea   :  { %v1129_v31 = vpop.f32.mrf.mxu1 }
 0x7eb   :  { %v1130_v35 = vadd.f32 %v1129_v31, %v2973_v9  ;;  %v1161_v42 = vadd.f32 %v1159_v41, %v1135_v34 }
 0x7ed   :  { %v1160_v40 = vadd.f32 %v1158_v39, %v1130_v35  ;;  %v1163_v45 = vmax.f32 %v1161_v42, 0.0 }
 0x7ef   :  { %v1162_v43 = vmax.f32 %v1160_v40, 0.0 }
 0x7f1   :  { %2125 = vmatmul.mubr.msk.f32.vlgmr.msra.gmra.mxu1 %vm69_vm1, %v1162_v43 }
 0x7f2   :  { %1249 = vmatprep.mubr.f32.mxu1 %v2698_v0  ;;  %2496 = vmatpush3.msra.mxu1 %v2144_v24 }
 0x7f3   :  { %2497 = vmatprep.subr.mxu1 %v2143_v44 }
 0x7f4   :  { %2498 = vmatpush3.msra.mxu1 %v2143_v44 }
 0x7f5   :  { %2126 = vmatmul.mubr.msk.f32.gmra.mxu1 %vm69_vm1, %v1163_v45  ;;  %2499 = vmatprep.subr.mxu1 %v2142_v46 }
 0x7f6   :  { %1255 = vmatprep.mubr.f32.mxu1 %v2698_v0  ;;  %2500 = vmatpush3.msra.mxu1 %v2142_v46 }
 0x7f7   :  { %2501 = vmatprep.subr.mxu1 %v2141_v48 }
 0x7f8   :  { %2502 = vmatpush3.msra.mxu1 %v2141_v48 }
 0x7f9   :  { %2127 = vmatmul.mubr.msk.f32.gmra.mxu1 %vm69_vm1, %v2849_v22  ;;  %2503 = vmatprep.subr.mxu1 %v2140_v47  ;;  %v2136_v22 = vld [vmem:[%s3415_s7 + $0xb8] sm:$0xff] }
 0x7fa   :  { %1260 = vmatprep.mubr.f32.mxu1 %v2698_v0  ;;  %2504 = vmatpush3.msra.mxu1 %v2140_v47 }
 0x7fb   :  { %2505 = vmatprep.subr.mxu1 %v2139_v49 }
 0x7fc   :  { %2506 = vmatpush3.msra.mxu1 %v2139_v49 }
 0x7fd   :  { %2128 = vmatmul.mubr.msk.f32.gmra.mxu1 %vm69_vm1, %v2863_v25  ;;  %2507 = vmatprep.subr.mxu1 %v2138_v50  ;;  %v2133_v25 = vld [vmem:[%s3415_s7 + $0xa0] sm:$0xff] }
 0x7fe   :  { %2508 = vmatpush3.msra.mxu1 %v2138_v50 }
 0x7ff   :  { %2509 = vmatprep.subr.mxu1 %v2137_v51 }
 0x800   :  { %2510 = vmatpush3.msra.mxu1 %v2137_v51 }
 0x801   :  { %2511 = vmatprep.subr.mxu1 %v2136_v22 }
 0x802   :  { %2512 = vmatpush3.msra.mxu1 %v2136_v22 }
 0x803   :  { %2513 = vmatprep.subr.mxu1 %v2135_v52 }
 0x804   :  { %2514 = vmatpush3.msra.mxu1 %v2135_v52 }
 0x805   :  { %2515 = vmatprep.subr.mxu1 %v2134_v53 }
 0x806   :  { %2516 = vmatpush3.msra.mxu1 %v2134_v53 }
 0x807   :  { %2517 = vmatprep.subr.mxu1 %v2133_v25 }
 0x808   :  { %2518 = vmatpush3.msra.mxu1 %v2133_v25 }
 0x809   :  { %2519 = vmatprep.subr.mxu1 %v2132_v54 }
 0x80a   :  { %2520 = vmatpush3.msra.mxu1 %v2132_v54 }
 0x80b   :  { %2521 = vmatprep.subr.mxu1 %v2131_v56 }
 0x80c   :  { %2522 = vmatpush3.msra.mxu1 %v2131_v56 }
 0x80d   :  { %2523 = vmatprep.subr.mxu1 %v2130_v62 }
 0x80e   :  { %2524 = vmatpush3.msra.mxu1 %v2130_v62 }
 0x80f   :  { %2525 = vmatprep.subr.mxu1 %v2129_v16 }
 0x810   :  { %2526 = vmatpush3.msra.mxu1 %v2129_v16 }
 0x811   :  { %2653 = vmatprep.subr.mxu1 %v2698_v0 }
 0x8b1   :  { %v1245_v17 = vpop.f32.mrf.mxu1 }
 0x8b2   :  { %2527 = vmatprep.mubr.f32.mxu1 %v1245_v17 }
 0x8b3   :  { %v3266_v18 = vpop.f32.mrf.mxu1 }
 0x8b5   :  { %v1251_v19 = vpop.f32.mrf.mxu1 }
 0x8b6   :  { %2528 = vmatmul.mubr.f32.vlgmr.msra.gmra.mxu1 %v1251_v19 }
 0x8b7   :  { %v3268_v20 = vpop.f32.mrf.mxu1 }
 0x8b9   :  { %v1257_v21 = vpop.f32.mrf.mxu1 }
 0x8ba   :  { %2530 = vmatprep.mubr.f32.mxu1 %v1257_v21 }
 0x8bb   :  { %v1259_v23 = vpop.f32.mrf.mxu1 }
 0x8bd   :  { %v1262_v24 = vpop.f32.mrf.mxu1 }
 0x8be   :  { %2531 = vmatmul.mubr.f32.gmra.mxu1 %v1262_v24 }
 0x8bf   :  { %v1264_v28 = vpop.f32.mrf.mxu1  ;;  %2547 = vmatprep.mubr.msk.f32.mxu1 %vm2699_vm0, %v2698_v0 }
 0x976   :  { %v2529_v29 = vpop.f32.mrf.mxu1 }
 0x977   :  { %1382 = vrot.lane.b32.xlu0 %v2529_v29, %s2702_s2 }
 0x978   :  { %v1349_v31 = vpop.f32.mrf.mxu1 }
 0x97b   :  { %1380 = vrot.lane.b32.xlu0 %v1349_v31, %s2702_s2 }
 0x97e   :  { %v2532_v33 = vpop.f32.mrf.mxu1 }
 0x97f   :  { %1372 = vrot.lane.b32.xlu1 %v2532_v33, %s2703_s1 }
 0x980   :  { %v1359_v34 = vpop.f32.mrf.mxu1 }
 0x983   :  { %1370 = vrot.lane.b32.xlu1 %v1359_v34, %s2703_s1 }
 0x987   :  { %1916 = vrot.lane.b32.xlu1 %v2971_v8, %s2704_s12 }
 0x98b   :  { %1999 = vrot.lane.b32.xlu1 %v3268_v20, %s2704_s12 }
 0x98f   :  { %1914 = vrot.lane.b32.xlu1 %v2973_v9, %s2704_s12 }
 0x993   :  { %1997 = vrot.lane.b32.xlu1 %v3266_v18, %s2704_s12 }
 0x9e9   :  { %v1383_v35 = vpop.permute.xlu0 %1382 }
 0x9ea   :  { %2534 = vmatpush3.msra.mxu0 %v1383_v35  ;;  %2657 = vmatpush3.msra.mxu1 %v1383_v35 }
 0x9eb   :  { %2535 = vmatprep.subr.mxu0 %v2698_v0  ;;  %2654 = vmatprep.subr.mxu1 %v2698_v0 }
 0x9ed   :  { %v1381_v39 = vpop.permute.xlu0 %1380 }
 0x9ee   :  { %2536 = vmatpush3.msra.mxu0 %v1381_v39  ;;  %2658 = vmatpush3.msra.mxu1 %v1381_v39 }
 0x9ef   :  { %2537 = vmatprep.subr.mxu0 %v2698_v0  ;;  %2655 = vmatprep.subr.mxu1 %v2698_v0 }
 0x9f1   :  { %v1373_v8 = vpop.permute.xlu1 %1372 }
 0x9f2   :  { %v1377_v40 = vadd.f32 %v2529_v29, %v1373_v8 }
 0x9f4   :  { %2538 = vmatpush3.msra.mxu0 %v1377_v40  ;;  %2659 = vmatpush3.msra.mxu1 %v1377_v40 }
 0x9f5   :  { %v1371_v9 = vpop.permute.xlu1 %1370  ;;  %2539 = vmatprep.subr.mxu0 %v2698_v0  ;;  %2656 = vmatprep.subr.mxu1 %v2698_v0 }
 0x9f6   :  { %v1376_v41 = vadd.f32 %v1371_v9, %v1349_v31 }
 0x9f8   :  { %2540 = vmatpush3.msra.mxu0 %v1376_v41  ;;  %2660 = vmatpush3.msra.mxu1 %v1376_v41 }
 0x9f9   :  { %2542 = vmatmul.mubr.msk.f32.vlgmr.msra.gmra.mxu0 %vm69_vm1, %v2901_v36  ;;  %2572 = vmatprep.subr.mxu1 %v2698_v0 }
 0x9fa   :  { %2548 = vmatmul.mubr.msk.f32.vlgmr.msra.gmra.mxu1 %vm69_vm1, %v2906_v37  ;;  %2544 = vmatprep.mubr.msk.f32.mxu0 %vm2699_vm0, %v2698_v0 }
 0x9fb   :  { %2573 = vmatpush3.msra.mxu1 %v1251_v19  ;;  %2576 = vmatprep.mubr.msk.f32.mxu1 %vm2699_vm0, %v2698_v0 }
 0x9fc   :  { %2574 = vmatprep.subr.mxu1 %v2698_v0 }
 0x9fd   :  { %2575 = vmatpush3.msra.mxu1 %v1245_v17  ;;  %2545 = vmatmul.mubr.msk.f32.gmra.mxu0 %vm69_vm1, %v2913_v38 }
 0x9fe   :  { %2556 = vmatprep.mubr.msk.f32.mxu0 %vm203_vm3, %v2946_v2  ;;  %2577 = vmatmul.mubr.msk.f32.vlgmr.msra.gmra.mxu1 %vm708_vm9, %v2901_v36 }
 0x9ff   :  { %2579 = vmatprep.mubr.msk.f32.mxu1 %vm2699_vm0, %v2698_v0  ;;  %2596 = vmatprep.subr.mxu1 %v2698_v0 }
 0xa00   :  { %2597 = vmatpush3.msra.mxu1 %v3039_v57 }
 0xa01   :  { %2598 = vmatprep.subr.mxu1 %v2698_v0 }
 0xa02   :  { %2580 = vmatmul.mubr.msk.f32.gmra.mxu1 %vm708_vm9, %v2913_v38 }
 0xa03   :  { %2582 = vmatprep.mubr.msk.f32.mxu1 %vm2699_vm0, %v2698_v0  ;;  %2599 = vmatpush3.msra.mxu1 %v3044_v61 }
 0xa04   :  { %2600 = vmatprep.subr.mxu1 %v2698_v0 }
 0xa05   :  { %2601 = vmatpush3.msra.mxu1 %v3051_v63 }
 0xa06   :  { %2583 = vmatmul.mubr.msk.f32.gmra.mxu1 %vm708_vm9, %v2906_v37  ;;  %2602 = vmatprep.subr.mxu1 %v2698_v0 }
 0xa07   :  { %2603 = vmatpush3.msra.mxu1 %v3058_v1  ;;  %2628 = vmatprep.mubr.msk.f32.mxu1 %vm2699_vm0, %v2698_v0 }
 0xa08   :  { %2604 = vmatprep.subr.mxu1 %v2698_v0 }
 0xa09   :  { %2605 = vmatpush3.msra.mxu1 %v3065_v3 }
 0xa0a   :  { %2606 = vmatprep.subr.mxu1 %v2698_v0 }
 0xa0b   :  { %2607 = vmatpush3.msra.mxu1 %v3072_v5 }
 0xa0c   :  { %2608 = vmatprep.subr.mxu1 %v2698_v0 }
 0xa0d   :  { %2609 = vmatpush3.msra.mxu1 %v3079_v6 }
 0xa0e   :  { %2610 = vmatprep.subr.mxu1 %v2698_v0 }
 0xa0f   :  { %2611 = vmatpush3.msra.mxu1 %v3086_v7 }
 0xa10   :  { %2612 = vmatprep.subr.mxu1 %v2698_v0 }
 0xa11   :  { %2613 = vmatpush3.msra.mxu1 %v3093_v10 }
 0xa12   :  { %2614 = vmatprep.subr.mxu1 %v2698_v0 }
 0xa13   :  { %2615 = vmatpush3.msra.mxu1 %v3100_v11 }
 0xa14   :  { %2616 = vmatprep.subr.mxu1 %v2698_v0 }
 0xa15   :  { %2617 = vmatpush3.msra.mxu1 %v3107_v12 }
 0xa16   :  { %2618 = vmatprep.subr.mxu1 %v2698_v0 }
 0xa17   :  { %2619 = vmatpush3.msra.mxu1 %v3114_v13 }
 0xa18   :  { %2620 = vmatprep.subr.mxu1 %v2698_v0 }
 0xa19   :  { %2621 = vmatpush3.msra.mxu1 %v3121_v14 }
 0xa1a   :  { %2622 = vmatprep.subr.mxu1 %v2698_v0 }
 0xa1b   :  { %2623 = vmatpush3.msra.mxu1 %v3128_v15 }
 0xa1c   :  { %2624 = vmatprep.subr.mxu1 %v2698_v0 }
 0xa1d   :  { %2625 = vmatpush3.msra.mxu1 %v3149_v30 }
 0xa1e   :  { %2626 = vmatprep.subr.mxu1 %v2698_v0 }
 0xa1f   :  { %2627 = vmatpush3.msra.mxu1 %v3156_v32 }
 0xab9   :  { %v1452_v36 = vpop.f32.mrf.mxu0 }
 0xaba   :  { %v1469_v37 = vmul.f32 0.2, %v1452_v36  ;;  %v1462_v38 = vpop.f32.mrf.mxu1  ;;  %vm1466_vm13 = vcmp.gt.f32.partialorder %v1452_v36, 0.0 }
 0xabb   :  { %v2543_v57 = vpop.f32.mrf.mxu0  ;;  %v1471_v61 = vmul.f32 0.2, %v1462_v38  ;;  %vm1468_vm14 = vcmp.gt.f32.partialorder %v1462_v38, 0.0 }
 0xabc   :  { %v2549_v63 = vpop.f32.mrf.mxu1  ;;  %v1472_v3 = vsel %vm1466_vm13, %v1452_v36, %v1469_v37 }
 0xabd   :  { %v1457_v1 = vpop.f32.mrf.mxu0  ;;  %v1474_v10 = vsel %vm1468_vm14, %v1462_v38, %v1471_v61  ;;  %v1475_v11 = vsel %vm608_vm6, %v1472_v3, -inf }
 0xabe   :  { %vm1467_vm15 = vcmp.gt.f32.partialorder %v1457_v1, 0.0  ;;  %v1470_v5 = vmul.f32 0.2, %v1457_v1  ;;  %v1477_v14 = vsel %vm608_vm6, %v1474_v10, -inf }
 0xabf   :  { %v2546_v6 = vpop.f32.mrf.mxu0 }
 0xac0   :  { %v1473_v7 = vsel %vm1467_vm15, %v1457_v1, %v1470_v5 }
 0xac1   :  { %v1476_v12 = vsel %vm608_vm6, %v1473_v7, -inf }
 0xac2   :  { %v1478_v13 = vmax.f32 %v1475_v11, %v1476_v12 }
 0xac4   :  { %v1479_v15 = vmax.f32 %v1478_v13, %v1477_v14 }
 0xac6   :  { %1480 = vmax.xlane.f32.xlu0 %v1479_v15 }
 0xb4f   :  { %v1481_v30 = vpop.xlane.xlu0 %1480 }
 0xb50   :  { %v1482_v32 = vrot.slane %v1481_v30, 4 }
 0xb52   :  { %v1483_v42 = vmax.f32 %v1481_v30, %v1482_v32 }
 0xb54   :  { %v1484_v43 = vrot.slane %v1483_v42, 2 }
 0xb56   :  { %v1485_v44 = vmax.f32 %v1483_v42, %v1484_v43 }
 0xb58   :  { %v1486_v46 = vrot.slane %v1485_v44, 1 }
 0xb5a   :  { %v1487_v45 = vmax.f32 %v1485_v44, %v1486_v46 }
 0xb5c   :  { %2663 = vpush %v1487_v45 }
 0xb8d   :  { %s2664_s7 = spop %2663 }
 0xb8e   :  { %v1489_v48 = vstv %s2664_s7 }
 0xb8f   :  { %v1491_v47 = vsub.f32 %v1473_v7, %v1489_v48  ;;  %v1492_v49 = vsub.f32 %v1474_v10, %v1489_v48  ;;  %v1490_v50 = vsub.f32 %v1472_v3, %v1489_v48  ;;  %v1917_v10 = vpop.permute.xlu1 %1916  ;;  %v2011_v48 = vld [vmem:[%s3422_s5] sm:$0x1] }
 0xb91   :  { %v1497_v51 = vmul.f32 1.442695, %v1492_v49  ;;  %v1495_v22 = vmul.f32 1.442695, %v1491_v47  ;;  %v1493_v52 = vmul.f32 1.442695, %v1490_v50 }
 0xb93   :  { %2686 = vpow2.f32 %v1497_v51  ;;  %v2000_v11 = vpop.permute.xlu1 %1999 }
 0xb94   :  { %2688 = vpow2.f32 %v1495_v22  ;;  %v2004_v30 = vsel %vm1149_vm12, %v3268_v20, %v2000_v11 }
 0xb95   :  { %2690 = vpow2.f32 %v1493_v52 }
 0xb97   :  { %v1915_v12 = vpop.permute.xlu1 %1914 }
 0xb9b   :  { %v1998_v14 = vpop.permute.xlu1 %1997 }
 0xba0   :  { %v2687_v53 = vpop.eup %2686 }
 0xba1   :  { %2550 = vmatprep.subr.mxu0 %v2687_v53  ;;  %v2689_v25 = vpop.eup %2688 }
 0xba2   :  { %2551 = vmatpush3.msra.mxu0 %v2687_v53  ;;  %v2691_v54 = vpop.eup %2690 }
 0xba3   :  { %2552 = vmatprep.subr.mxu0 %v2689_v25 }
 0xba4   :  { %2553 = vmatpush3.msra.mxu0 %v2689_v25 }
 0xba5   :  { %2554 = vmatprep.subr.mxu0 %v2691_v54 }
 0xba6   :  { %2555 = vmatpush3.msra.mxu0 %v2691_v54 }
 0xba7   :  { %2557 = vmatmul.mubr.msk.f32.vlgmr.msra.gmra.mxu0 %vm203_vm3, %v2950_v4  ;;  %2559 = vmatprep.subr.mxu0 %v2698_v0 }
 0xba8   :  { %2563 = vmatprep.mubr.msk.f32.mxu0 %vm2699_vm0, %v2698_v0 }
 0xc67   :  { %v2558_v56 = vpop.f32.mrf.mxu0 }
 0xc68   :  { %2560 = vmatpush3.msra.mxu0 %v2558_v56 }
 0xc69   :  { %v1565_v62 = vpop.f32.mrf.mxu0  ;;  %2561 = vmatprep.subr.mxu0 %v2698_v0 }
 0xc6a   :  { %2562 = vmatpush3.msra.mxu0 %v1565_v62 }
 0xc6b   :  { %2564 = vmatmul.mubr.msk.f32.vlgmr.msra.gmra.mxu0 %vm708_vm9, %v2930_v58  ;;  %2585 = vmatprep.subr.mxu0 %v2698_v0  ;;  %v1726_v58 = vpop.f32.mrf.mxu1 }
 0xc6c   :  { %2566 = vmatprep.mubr.msk.f32.mxu0 %vm2699_vm0, %v2698_v0  ;;  %2586 = vmatpush3.msk.msra.mxu0 %vm896_vm10, %v3030_v55 }
 0xc6d   :  { %v2578_v16 = vpop.f32.mrf.mxu1 }
 0xc6f   :  { %2567 = vmatmul.mubr.msk.f32.gmra.mxu0 %vm708_vm9, %v2933_v59  ;;  %v1731_v34 = vpop.f32.mrf.mxu1 }
 0xc70   :  { %2569 = vmatprep.mubr.msk.f32.mxu0 %vm2699_vm0, %v2698_v0 }
 0xc71   :  { %v2581_v35 = vpop.f32.mrf.mxu1 }
 0xc73   :  { %2570 = vmatmul.mubr.msk.f32.gmra.mxu0 %vm708_vm9, %v2936_v60  ;;  %v1736_v39 = vpop.f32.mrf.mxu1 }
 0xc74   :  { %2587 = vmatprep.mubr.msk.f32.mxu0 %vm2699_vm0, %v2698_v0 }
 0xc75   :  { %v2584_v8 = vpop.f32.mrf.mxu1 }
 0xd2b   :  { %v1640_v17 = vpop.f32.mrf.mxu0 }
 0xd2c   :  { %2692 = vrcp.f32 %v1640_v17 }
 0xd2d   :  { %v2565_v19 = vpop.f32.mrf.mxu0 }
 0xd2f   :  { %v1645_v21 = vpop.f32.mrf.mxu0 }
 0xd30   :  { %2694 = vrcp.f32 %v1645_v21 }
 0xd31   :  { %v2568_v55 = vpop.f32.mrf.mxu0 }
 0xd33   :  { %v1650_v23 = vpop.f32.mrf.mxu0 }
 0xd34   :  { %2696 = vrcp.f32 %v1650_v23 }
 0xd35   :  { %v2571_v59 = vpop.f32.mrf.mxu0 }
 0xd39   :  { %v2693_v24 = vpop.eup %2692 }
 0xd3a   :  { %v1655_v28 = vmul.f32 %v2693_v24, %v2691_v54 }
 0xd3c   :  { %2588 = vmatmul.mubr.msk.f32.vlgmr.msra.gmra.mxu0 %vm608_vm6, %v1655_v28 }
 0xd3d   :  { %v2695_v29 = vpop.eup %2694  ;;  %2590 = vmatprep.mubr.msk.f32.mxu0 %vm2699_vm0, %v2698_v0 }
 0xd3e   :  { %v1657_v60 = vmul.f32 %v2695_v29, %v2689_v25 }
 0xd40   :  { %2591 = vmatmul.mubr.msk.f32.gmra.mxu0 %vm608_vm6, %v1657_v60 }
 0xd41   :  { %v2697_v31 = vpop.eup %2696  ;;  %2593 = vmatprep.mubr.msk.f32.mxu0 %vm2699_vm0, %v2698_v0 }
 0xd42   :  { %v1659_v33 = vmul.f32 %v2697_v31, %v2687_v53 }
 0xd44   :  { %2594 = vmatmul.mubr.msk.f32.gmra.mxu0 %vm608_vm6, %v1659_v33 }
 0xd45   :  { %2643 = vmatprep.mubr.msk.f32.mxu0 %vm203_vm3, %v2946_v2 }
 0xdfc   :  { %v1815_v40 = vpop.f32.mrf.mxu0 }
 0xdfd   :  { %v1829_v9 = vmul.f32 %v1815_v40, %v1726_v58 }
 0xdfe   :  { %v2589_v41 = vpop.f32.mrf.mxu0 }
 0xdff   :  { %2629 = vmatmul.mubr.f32.vlgmr.msra.gmra.mxu1 %v1829_v9 }
 0xe00   :  { %v1820_v36 = vpop.f32.mrf.mxu0  ;;  %2631 = vmatprep.mubr.msk.f32.mxu1 %vm2699_vm0, %v2698_v0 }
 0xe01   :  { %v1830_v37 = vmul.f32 %v1820_v36, %v1731_v34 }
 0xe02   :  { %v2592_v38 = vpop.f32.mrf.mxu0 }
 0xe03   :  { %2632 = vmatmul.mubr.f32.gmra.mxu1 %v1830_v37 }
 0xe04   :  { %v1825_v57 = vpop.f32.mrf.mxu0  ;;  %2634 = vmatprep.mubr.msk.f32.mxu1 %vm2699_vm0, %v2698_v0 }
 0xe05   :  { %v1831_v2 = vmul.f32 %v1825_v57, %v1736_v39 }
 0xe06   :  { %v2595_v61 = vpop.f32.mrf.mxu0 }
 0xe07   :  { %2635 = vmatmul.mubr.f32.gmra.mxu1 %v1831_v2 }
 0xebf   :  { %v1898_v63 = vpop.f32.mrf.mxu1 }
 0xec1   :  { %v2630_v1 = vpop.f32.mrf.mxu1 }
 0xec3   :  { %v1903_v3 = vpop.f32.mrf.mxu1 }
 0xec5   :  { %v2633_v5 = vpop.f32.mrf.mxu1 }
 0xec7   :  { %v1908_v6 = vpop.f32.mrf.mxu1 }
 0xec8   :  { %2637 = vmatprep.subr.mxu0 %v1908_v6 }
 0xec9   :  { %v2636_v7 = vpop.f32.mrf.mxu1  ;;  %2638 = vmatpush3.msra.mxu0 %v1908_v6 }
 0xeca   :  { %2639 = vmatprep.subr.mxu0 %v1903_v3 }
 0xecb   :  { %2640 = vmatpush3.msra.mxu0 %v1903_v3 }
 0xecc   :  { %2641 = vmatprep.subr.mxu0 %v1898_v63 }
 0xecd   :  { %2642 = vmatpush3.msra.mxu0 %v1898_v63 }
 0xece   :  { %2644 = vmatmul.mubr.msk.f32.vlgmr.msra.gmra.mxu0 %vm203_vm3, %v2950_v4  ;;  %2646 = vmatprep.subr.mxu0 %v2698_v0  ;;  %v2003_v4 = vsel %vm1148_vm11, %v3266_v18, %v1998_v14 }
 0xecf   :  { %2650 = vmatprep.mubr.msk.f32.mxu0 %vm2699_vm0, %v2698_v0  ;;  %vm2085_vm0 = vcmask 253952  }
 0xf8e   :  { %v2645_v13 = vpop.f32.mrf.mxu0 }
 0xf8f   :  { %v1992_v15 = vadd.f32 %v2645_v13, %v1917_v10 }
 0xf90   :  { %v1986_v32 = vpop.f32.mrf.mxu0 }
 0xf91   :  { %v2006_v42 = vadd.f32 %v2004_v30, %v1992_v15  ;;  %v1987_v43 = vadd.f32 %v1986_v32, %v1915_v12 }
 0xf93   :  { %v2008_v44 = vmax.f32 %v2006_v42, 0.0  ;;  %v2005_v46 = vadd.f32 %v2003_v4, %v1987_v43 }
 0xf95   :  { %v2007_v45 = vmax.f32 %v2005_v46, 0.0  ;;  %2647 = vmatpush3.msra.mxu0 %v2008_v44  ;;  %2010 = vst.msk [vmem:[%s3423_s11 + $0x8] sm:$0xff] %vm69_vm1, %v2008_v44 }
 0xf96   :  { %2648 = vmatprep.subr.mxu0 %v2698_v0 }
 0xf97   :  { %2649 = vmatpush3.msra.mxu0 %v2007_v45  ;;  %2009 = vst.msk [vmem:[%s3423_s11] sm:$0xff] %vm69_vm1, %v2007_v45 }
 0xf98   :  { %2651 = vmatmul.mubr.msk.f32.vlgmr.msra.gmra.mxu0 %vm708_vm9, %v2011_v48 }
0x1058   :  { %v2081_v26 = vpop.f32.mrf.mxu0 }
0x1059   :  { %2086 = vst.msk [vmem:[%s3423_s11 + $0x10] sm:$0x1] %vm2085_vm0, %v2081_v26 }
0x105a   :  { %v2652_v27 = vpop.f32.mrf.mxu0 }

</bundles_post_ra>
